<compile_context>
chip_gen: v7x
topology: tpu7x:2x2x1
jax: 0.10.0
libtpu: 0.0.40
codegen_flags: <defaults>
</compile_context>

<pallas_src>
import numpy as np
import jax
import jax.numpy as jnp
from jax.experimental import pallas as pl
from jax.experimental.pallas import tpu as pltpu


# ------------------------------------------------------------------ filter taps
def get_kernel(factor, kernel_type, phase, kernel_width, support=None, sigma=None):
    assert kernel_type in ['lanczos', 'gauss', 'box']
    if phase == 0.5 and kernel_type != 'box':
        kernel = np.zeros([kernel_width - 1, kernel_width - 1])
    else:
        kernel = np.zeros([kernel_width, kernel_width])
    if kernel_type == 'box':
        assert phase == 0.5, 'Box filter is always half-phased'
        kernel[:] = 1.0 / (kernel_width * kernel_width)
    elif kernel_type == 'gauss':
        assert sigma, 'sigma is not specified'
        assert phase != 0.5, 'phase 1/2 for gauss not implemented'
        center = (kernel_width + 1.0) / 2.0
        sigma_sq = sigma * sigma
        for i in range(1, kernel.shape[0] + 1):
            for j in range(1, kernel.shape[1] + 1):
                di = (i - center) / 2.0
                dj = (j - center) / 2.0
                kernel[i - 1][j - 1] = np.exp(-(di * di + dj * dj) / (2 * sigma_sq))
                kernel[i - 1][j - 1] = kernel[i - 1][j - 1] / (2.0 * np.pi * sigma_sq)
    elif kernel_type == 'lanczos':
        assert support, 'support is not specified'
        center = (kernel_width + 1) / 2.0
        for i in range(1, kernel.shape[0] + 1):
            for j in range(1, kernel.shape[1] + 1):
                if phase == 0.5:
                    di = abs(i + 0.5 - center) / factor
                    dj = abs(j + 0.5 - center) / factor
                else:
                    di = abs(i - center) / factor
                    dj = abs(j - center) / factor
                val = 1
                if di != 0:
                    val = val * support * np.sin(np.pi * di) * np.sin(np.pi * di / support)
                    val = val / (np.pi * np.pi * di * di)
                if dj != 0:
                    val = val * support * np.sin(np.pi * dj) * np.sin(np.pi * dj / support)
                    val = val / (np.pi * np.pi * dj * dj)
                kernel[i - 1][j - 1] = val
    else:
        assert False, 'wrong method name'
    kernel /= kernel.sum()
    return kernel


def make_downsampler_config(n_planes, factor, kernel_type, phase=0, kernel_width=None,
                            support=None, sigma=None, preserve_size=False):
    """Mirrors Downsampler.__init__ (deterministic parameter construction)."""
    assert phase in [0, 0.5], 'phase should be 0 or 0.5'
    if kernel_type == 'lanczos2':
        support, kernel_width, kernel_type_ = 2, 4 * factor + 1, 'lanczos'
    elif kernel_type == 'lanczos3':
        support, kernel_width, kernel_type_ = 3, 6 * factor + 1, 'lanczos'
    elif kernel_type == 'gauss12':
        kernel_width, sigma, kernel_type_ = 7, 1 / 2, 'gauss'
    elif kernel_type == 'gauss1sq2':
        kernel_width, sigma, kernel_type_ = 9, 1.0 / np.sqrt(2), 'gauss'
    elif kernel_type in ['lanczos', 'gauss', 'box']:
        kernel_type_ = kernel_type
    else:
        assert False, 'wrong name kernel'
    kernel = get_kernel(factor, kernel_type_, phase, kernel_width,
                        support=support, sigma=sigma)
    pad = None
    if preserve_size:
        if kernel.shape[0] % 2 == 1:
            pad = int((kernel.shape[0] - 1) / 2.0)
        else:
            pad = int((kernel.shape[0] - factor) / 2.0)
    return kernel.astype(np.float32), pad, factor, n_planes


# ------------------------------------------------------------------ helpers
def _decimation_matrix(n_in, n_out, taps, stride, pad):
    """E[o, i] = sum of taps k with clip(o*stride + k - pad, 0, n_in-1) == i.

    Folds the 1-D correlation, the stride, and the replication padding into one
    small banded matrix (built in float64, cast to float32 once).
    """
    E = np.zeros((n_out, n_in), np.float64)
    for o in range(n_out):
        for k, t in enumerate(taps):
            i = min(max(o * stride + k - pad, 0), n_in - 1)
            E[o, i] += float(t)
    return E


def _choose_block_planes(nb, per_plane_bytes, budget):
    """Largest divisor of nb whose (double-buffered) block fits the VMEM budget."""
    divisors = [d for d in range(1, nb + 1) if nb % d == 0]
    fitting = [d for d in divisors if d * per_plane_bytes <= budget]
    # TODO(synk): if even Bp=1 does not fit, row-tile the planes instead.
    return max(fitting) if fitting else 1


# ------------------------------------------------------------------ Pallas kernel
def _downsample_kernel(x_ref, ew_ref, eh_ref, o_ref, tmp_ref):
    """Per-plane  y = E_h @ (x @ E_w)  on the MXU (f32 accumulate).

    x_ref  : VMEM (Bp, H, W)     raw (un-padded) input planes
    ew_ref : VMEM (W, Wo)        column decimation matrix (stride + pad folded in)
    eh_ref : VMEM (Ho, H)        row decimation matrix
    o_ref  : VMEM (Bp, Ho, Wo)   exact-shape output (no crop needed afterwards)
    tmp_ref: VMEM (H, Wo) f32    per-plane intermediate (bounds vreg pressure)
    """
    ew = ew_ref[...]
    eh = eh_ref[...]
    bp = x_ref.shape[0]

    def one_plane(b):
        tmp_ref[...] = jnp.dot(
            x_ref[b], ew,
            preferred_element_type=jnp.float32,
            precision=jax.lax.Precision.HIGHEST)
        o_ref[b] = jnp.dot(
            eh, tmp_ref[...],
            preferred_element_type=jnp.float32,
            precision=jax.lax.Precision.HIGHEST).astype(o_ref.dtype)   # bias == 0

    if bp <= 16:
        # Small block: static unroll gives the scheduler full visibility.
        for b in range(bp):
            one_plane(b)
    else:
        # Large block: keep code size and live ranges bounded.
        def body(b, carry):
            one_plane(b)
            return carry
        jax.lax.fori_loop(0, bp, body, None)


# ------------------------------------------------------------------ forward
def downsampler_forward(x, kernel, factor, pad):
    """Forward pass of Downsampler.  x: (N, C, H, W) float32, NCHW."""
    N, C, H, W = x.shape
    kh, kw = kernel.shape
    s = int(factor)
    p = int(pad) if pad else 0

    # ---- exact rank-1 (separable) factorization of the normalized 2-D kernel
    k2 = np.asarray(kernel, np.float64)
    k_h_1d = k2.sum(axis=1)
    k_w_1d = k2.sum(axis=0) / k2.sum()
    recon = np.outer(k_h_1d, k_w_1d)
    assert np.max(np.abs(recon - k2)) <= 1e-4 * max(float(np.max(np.abs(k2))), 1e-12), \
        'Downsampler kernel is not separable'

    Hp, Wp = H + 2 * p, W + 2 * p
    Ho = (Hp - kh) // s + 1
    Wo = (Wp - kw) // s + 1

    # ---- banded decimation matrices (stride + replication pad folded in)
    E_h = jnp.asarray(_decimation_matrix(H, Ho, k_h_1d, s, p).astype(np.float32))        # (Ho, H)
    E_w = jnp.asarray(_decimation_matrix(W, Wo, k_w_1d, s, p).T.copy().astype(np.float32))  # (W, Wo)

    NB = N * C
    xf = x.reshape(NB, H, W)   # free: no padding, no polyphase transpose, no extra HBM pass

    # ---- generation-aware VMEM budgeting
    try:
        vmem_cap = int(pltpu.get_tpu_info().vmem_capacity_bytes)
    except Exception:  # pragma: no cover - conservative fallback (v7x-sized)
        vmem_cap = 64 << 20
    budget = min(vmem_cap // 2, 48 << 20)          # ~32 MiB on v7x, 48 MiB on v5e/v6e

    per_plane = 2 * H * W * 4 + 2 * Ho * Wo * 4    # double-buffered input + output
    fixed = 2 * 4 * (int(E_w.size) + int(E_h.size)) + H * Wo * 4 + (1 << 20)
    Bp = _choose_block_planes(NB, per_plane, max(budget - fixed, per_plane))
    grid = (NB // Bp,)
    # TODO(synk): on v7x prefer an even grid extent for balanced 2-TC megacore shards.

    vmem_needed = Bp * per_plane + fixed + (2 << 20)
    vmem_limit = int(min(vmem_cap - (12 << 20), max(vmem_needed, 32 << 20)))

    out = pl.pallas_call(
        _downsample_kernel,
        out_shape=jax.ShapeDtypeStruct((NB, Ho, Wo), x.dtype),
        grid=grid,
        in_specs=[
            pl.BlockSpec((Bp, H, W), lambda i: (i, 0, 0)),
            pl.BlockSpec((W, Wo), lambda i: (0, 0)),   # constant block: fetched once
            pl.BlockSpec((Ho, H), lambda i: (0, 0)),   # constant block: fetched once
        ],
        out_specs=pl.BlockSpec((Bp, Ho, Wo), lambda i: (i, 0, 0)),
        scratch_shapes=[pltpu.VMEM((H, Wo), jnp.float32)],
        compiler_params=pltpu.CompilerParams(
            dimension_semantics=("parallel",),
            vmem_limit_bytes=vmem_limit),
    )(xf, E_w, E_h)

    return out.reshape(N, C, Ho, Wo)   # free reshape, no crop copy


# ------------------------------------------------------------------ main
if __name__ == "__main__":
    # Downsampler(n_planes=4, factor=2, kernel_type='lanczos2', phase=0.5, preserve_size=True)
    kernel_np, pad, factor, n_planes = make_downsampler_config(
        n_planes=4, factor=2, kernel_type='lanczos2', phase=0.5, preserve_size=True)

    key = jax.random.PRNGKey(0)
    x = jax.random.normal(key, (2, n_planes, 16, 16), dtype=jnp.float32)

    out = downsampler_forward(x, kernel_np, factor, pad)
    out = jax.block_until_ready(out)

    # Reference: the exact Conv2d the PyTorch module builds (diagonal weight, zero bias)
    # applied to the replication-padded input.
    C = n_planes
    kh, kw = kernel_np.shape
    w_full = np.zeros((C, C, kh, kw), np.float32)
    for i in range(C):
        w_full[i, i] = kernel_np
    x_pad = jnp.pad(x, ((0, 0), (0, 0), (pad, pad), (pad, pad)), mode='edge')
    ref = jax.lax.conv_general_dilated(
        x_pad, jnp.asarray(w_full), window_strides=(factor, factor), padding='VALID',
        dimension_numbers=('NCHW', 'OIHW', 'NCHW'),
        precision=jax.lax.Precision.HIGHEST)
    np.testing.assert_allclose(np.asarray(out), np.asarray(ref), rtol=1e-5, atol=1e-5)

    print("KERNEL_OK")
</pallas_src>

<mosaic_0001>
module attributes {stable_mosaic.version = 11 : i64} {
  func.func @_downsample_kernel(%arg0: i32, %arg1: memref<8x16x16xf32, #tpu.memory_space<vmem>>, %arg2: memref<16x8xf32, #tpu.memory_space<vmem>>, %arg3: memref<8x16xf32, #tpu.memory_space<vmem>>, %arg4: memref<8x8x8xf32, #tpu.memory_space<vmem>>, %arg5: memref<16x8xf32, #tpu.memory_space<vmem>>) attributes {dimension_semantics = [#tpu.dimension_semantics<parallel>], iteration_bounds = array<i64: 1>, scalar_prefetch = 0 : i64, scratch_operands = 1 : i64, tpu.core_type = #tpu.core_type<tc>, window_params = [{transform_indices = @transform_0, window_bounds = array<i64: 8, 16, 16>}, {pipeline_mode = #tpu.pipeline_mode<synchronous>, transform_indices = @transform_1, window_bounds = array<i64: 16, 8>}, {pipeline_mode = #tpu.pipeline_mode<synchronous>, transform_indices = @transform_2, window_bounds = array<i64: 8, 16>}, {transform_indices = @transform_3, window_bounds = array<i64: 8, 8, 8>}]} {
    %c0 = arith.constant 0 : index
    %c0_0 = arith.constant 0 : index
    %0 = vector.load %arg2[%c0, %c0_0] : memref<16x8xf32, #tpu.memory_space<vmem>>, vector<16x8xf32>
    %c0_1 = arith.constant 0 : index
    %c0_2 = arith.constant 0 : index
    %1 = vector.load %arg3[%c0_1, %c0_2] : memref<8x16xf32, #tpu.memory_space<vmem>>, vector<8x16xf32>
    %c0_3 = arith.constant 0 : index
    %c0_4 = arith.constant 0 : index
    %c0_5 = arith.constant 0 : index
    %2 = vector.load %arg1[%c0_3, %c0_4, %c0_5] : memref<8x16x16xf32, #tpu.memory_space<vmem>>, vector<1x16x16xf32>
    %3 = vector.shape_cast %2 : vector<1x16x16xf32> to vector<16x16xf32>
    %cst = arith.constant dense<0.000000e+00> : vector<16x8xf32>
    %4 = tpu.matmul %3, %0, %cst {dimension_numbers = #tpu.dot_dimension_numbers<[1], [0], [0], [1], [0, 0, 1, 1], [], []>, precision = #tpu.contract_precision<fp32>} : vector<16x16xf32>, vector<16x8xf32>, vector<16x8xf32> -> vector<16x8xf32>
    %c0_6 = arith.constant 0 : index
    %c0_7 = arith.constant 0 : index
    %5 = vector.load %arg5[%c0_6, %c0_7] : memref<16x8xf32, #tpu.memory_space<vmem>>, vector<16x8xf32>
    tpu.vector_store %arg5[%c0_6, %c0_7], %4 {strides = array<i32>} : memref<16x8xf32, #tpu.memory_space<vmem>>, vector<16x8xf32>,
    %c0_8 = arith.constant 0 : index
    %c0_9 = arith.constant 0 : index
    %6 = vector.load %arg5[%c0_8, %c0_9] : memref<16x8xf32, #tpu.memory_space<vmem>>, vector<16x8xf32>
    %cst_10 = arith.constant dense<0.000000e+00> : vector<8x8xf32>
    %7 = tpu.matmul %1, %6, %cst_10 {dimension_numbers = #tpu.dot_dimension_numbers<[1], [0], [0], [1], [0, 0, 1, 1], [], []>, precision = #tpu.contract_precision<fp32>} : vector<8x16xf32>, vector<16x8xf32>, vector<8x8xf32> -> vector<8x8xf32>
    %c0_11 = arith.constant 0 : index
    %c0_12 = arith.constant 0 : index
    %c0_13 = arith.constant 0 : index
    %8 = vector.load %arg4[%c0_11, %c0_12, %c0_13] : memref<8x8x8xf32, #tpu.memory_space<vmem>>, vector<1x8x8xf32>
    %9 = vector.shape_cast %8 : vector<1x8x8xf32> to vector<8x8xf32>
    %10 = vector.shape_cast %7 : vector<8x8xf32> to vector<1x8x8xf32>
    tpu.vector_store %arg4[%c0_11, %c0_12, %c0_13], %10 {strides = array<i32>} : memref<8x8x8xf32, #tpu.memory_space<vmem>>, vector<1x8x8xf32>,
    %c1 = arith.constant 1 : index
    %c0_14 = arith.constant 0 : index
    %c0_15 = arith.constant 0 : index
    %11 = vector.load %arg1[%c1, %c0_14, %c0_15] : memref<8x16x16xf32, #tpu.memory_space<vmem>>, vector<1x16x16xf32>
    %12 = vector.shape_cast %11 : vector<1x16x16xf32> to vector<16x16xf32>
    %cst_16 = arith.constant dense<0.000000e+00> : vector<16x8xf32>
    %13 = tpu.matmul %12, %0, %cst_16 {dimension_numbers = #tpu.dot_dimension_numbers<[1], [0], [0], [1], [0, 0, 1, 1], [], []>, precision = #tpu.contract_precision<fp32>} : vector<16x16xf32>, vector<16x8xf32>, vector<16x8xf32> -> vector<16x8xf32>
    %c0_17 = arith.constant 0 : index
    %c0_18 = arith.constant 0 : index
    %14 = vector.load %arg5[%c0_17, %c0_18] : memref<16x8xf32, #tpu.memory_space<vmem>>, vector<16x8xf32>
    tpu.vector_store %arg5[%c0_17, %c0_18], %13 {strides = array<i32>} : memref<16x8xf32, #tpu.memory_space<vmem>>, vector<16x8xf32>,
    %c0_19 = arith.constant 0 : index
    %c0_20 = arith.constant 0 : index
    %15 = vector.load %arg5[%c0_19, %c0_20] : memref<16x8xf32, #tpu.memory_space<vmem>>, vector<16x8xf32>
    %cst_21 = arith.constant dense<0.000000e+00> : vector<8x8xf32>
    %16 = tpu.matmul %1, %15, %cst_21 {dimension_numbers = #tpu.dot_dimension_numbers<[1], [0], [0], [1], [0, 0, 1, 1], [], []>, precision = #tpu.contract_precision<fp32>} : vector<8x16xf32>, vector<16x8xf32>, vector<8x8xf32> -> vector<8x8xf32>
    %c1_22 = arith.constant 1 : index
    %c0_23 = arith.constant 0 : index
    %c0_24 = arith.constant 0 : index
    %17 = vector.load %arg4[%c1_22, %c0_23, %c0_24] : memref<8x8x8xf32, #tpu.memory_space<vmem>>, vector<1x8x8xf32>
    %18 = vector.shape_cast %17 : vector<1x8x8xf32> to vector<8x8xf32>
    %19 = vector.shape_cast %16 : vector<8x8xf32> to vector<1x8x8xf32>
    tpu.vector_store %arg4[%c1_22, %c0_23, %c0_24], %19 {strides = array<i32>} : memref<8x8x8xf32, #tpu.memory_space<vmem>>, vector<1x8x8xf32>,
    %c2 = arith.constant 2 : index
    %c0_25 = arith.constant 0 : index
    %c0_26 = arith.constant 0 : index
    %20 = vector.load %arg1[%c2, %c0_25, %c0_26] : memref<8x16x16xf32, #tpu.memory_space<vmem>>, vector<1x16x16xf32>
    %21 = vector.shape_cast %20 : vector<1x16x16xf32> to vector<16x16xf32>
    %cst_27 = arith.constant dense<0.000000e+00> : vector<16x8xf32>
    %22 = tpu.matmul %21, %0, %cst_27 {dimension_numbers = #tpu.dot_dimension_numbers<[1], [0], [0], [1], [0, 0, 1, 1], [], []>, precision = #tpu.contract_precision<fp32>} : vector<16x16xf32>, vector<16x8xf32>, vector<16x8xf32> -> vector<16x8xf32>
    %c0_28 = arith.constant 0 : index
    %c0_29 = arith.constant 0 : index
    %23 = vector.load %arg5[%c0_28, %c0_29] : memref<16x8xf32, #tpu.memory_space<vmem>>, vector<16x8xf32>
    tpu.vector_store %arg5[%c0_28, %c0_29], %22 {strides = array<i32>} : memref<16x8xf32, #tpu.memory_space<vmem>>, vector<16x8xf32>,
    %c0_30 = arith.constant 0 : index
    %c0_31 = arith.constant 0 : index
    %24 = vector.load %arg5[%c0_30, %c0_31] : memref<16x8xf32, #tpu.memory_space<vmem>>, vector<16x8xf32>
    %cst_32 = arith.constant dense<0.000000e+00> : vector<8x8xf32>
    %25 = tpu.matmul %1, %24, %cst_32 {dimension_numbers = #tpu.dot_dimension_numbers<[1], [0], [0], [1], [0, 0, 1, 1], [], []>, precision = #tpu.contract_precision<fp32>} : vector<8x16xf32>, vector<16x8xf32>, vector<8x8xf32> -> vector<8x8xf32>
    %c2_33 = arith.constant 2 : index
    %c0_34 = arith.constant 0 : index
    %c0_35 = arith.constant 0 : index
    %26 = vector.load %arg4[%c2_33, %c0_34, %c0_35] : memref<8x8x8xf32, #tpu.memory_space<vmem>>, vector<1x8x8xf32>
    %27 = vector.shape_cast %26 : vector<1x8x8xf32> to vector<8x8xf32>
    %28 = vector.shape_cast %25 : vector<8x8xf32> to vector<1x8x8xf32>
    tpu.vector_store %arg4[%c2_33, %c0_34, %c0_35], %28 {strides = array<i32>} : memref<8x8x8xf32, #tpu.memory_space<vmem>>, vector<1x8x8xf32>,
    %c3 = arith.constant 3 : index
    %c0_36 = arith.constant 0 : index
    %c0_37 = arith.constant 0 : index
    %29 = vector.load %arg1[%c3, %c0_36, %c0_37] : memref<8x16x16xf32, #tpu.memory_space<vmem>>, vector<1x16x16xf32>
    %30 = vector.shape_cast %29 : vector<1x16x16xf32> to vector<16x16xf32>
    %cst_38 = arith.constant dense<0.000000e+00> : vector<16x8xf32>
    %31 = tpu.matmul %30, %0, %cst_38 {dimension_numbers = #tpu.dot_dimension_numbers<[1], [0], [0], [1], [0, 0, 1, 1], [], []>, precision = #tpu.contract_precision<fp32>} : vector<16x16xf32>, vector<16x8xf32>, vector<16x8xf32> -> vector<16x8xf32>
    %c0_39 = arith.constant 0 : index
    %c0_40 = arith.constant 0 : index
    %32 = vector.load %arg5[%c0_39, %c0_40] : memref<16x8xf32, #tpu.memory_space<vmem>>, vector<16x8xf32>
    tpu.vector_store %arg5[%c0_39, %c0_40], %31 {strides = array<i32>} : memref<16x8xf32, #tpu.memory_space<vmem>>, vector<16x8xf32>,
    %c0_41 = arith.constant 0 : index
    %c0_42 = arith.constant 0 : index
    %33 = vector.load %arg5[%c0_41, %c0_42] : memref<16x8xf32, #tpu.memory_space<vmem>>, vector<16x8xf32>
    %cst_43 = arith.constant dense<0.000000e+00> : vector<8x8xf32>
    %34 = tpu.matmul %1, %33, %cst_43 {dimension_numbers = #tpu.dot_dimension_numbers<[1], [0], [0], [1], [0, 0, 1, 1], [], []>, precision = #tpu.contract_precision<fp32>} : vector<8x16xf32>, vector<16x8xf32>, vector<8x8xf32> -> vector<8x8xf32>
    %c3_44 = arith.constant 3 : index
    %c0_45 = arith.constant 0 : index
    %c0_46 = arith.constant 0 : index
    %35 = vector.load %arg4[%c3_44, %c0_45, %c0_46] : memref<8x8x8xf32, #tpu.memory_space<vmem>>, vector<1x8x8xf32>
    %36 = vector.shape_cast %35 : vector<1x8x8xf32> to vector<8x8xf32>
    %37 = vector.shape_cast %34 : vector<8x8xf32> to vector<1x8x8xf32>
    tpu.vector_store %arg4[%c3_44, %c0_45, %c0_46], %37 {strides = array<i32>} : memref<8x8x8xf32, #tpu.memory_space<vmem>>, vector<1x8x8xf32>,
    %c4 = arith.constant 4 : index
    %c0_47 = arith.constant 0 : index
    %c0_48 = arith.constant 0 : index
    %38 = vector.load %arg1[%c4, %c0_47, %c0_48] : memref<8x16x16xf32, #tpu.memory_space<vmem>>, vector<1x16x16xf32>
    %39 = vector.shape_cast %38 : vector<1x16x16xf32> to vector<16x16xf32>
    %cst_49 = arith.constant dense<0.000000e+00> : vector<16x8xf32>
    %40 = tpu.matmul %39, %0, %cst_49 {dimension_numbers = #tpu.dot_dimension_numbers<[1], [0], [0], [1], [0, 0, 1, 1], [], []>, precision = #tpu.contract_precision<fp32>} : vector<16x16xf32>, vector<16x8xf32>, vector<16x8xf32> -> vector<16x8xf32>
    %c0_50 = arith.constant 0 : index
    %c0_51 = arith.constant 0 : index
    %41 = vector.load %arg5[%c0_50, %c0_51] : memref<16x8xf32, #tpu.memory_space<vmem>>, vector<16x8xf32>
    tpu.vector_store %arg5[%c0_50, %c0_51], %40 {strides = array<i32>} : memref<16x8xf32, #tpu.memory_space<vmem>>, vector<16x8xf32>,
    %c0_52 = arith.constant 0 : index
    %c0_53 = arith.constant 0 : index
    %42 = vector.load %arg5[%c0_52, %c0_53] : memref<16x8xf32, #tpu.memory_space<vmem>>, vector<16x8xf32>
    %cst_54 = arith.constant dense<0.000000e+00> : vector<8x8xf32>
    %43 = tpu.matmul %1, %42, %cst_54 {dimension_numbers = #tpu.dot_dimension_numbers<[1], [0], [0], [1], [0, 0, 1, 1], [], []>, precision = #tpu.contract_precision<fp32>} : vector<8x16xf32>, vector<16x8xf32>, vector<8x8xf32> -> vector<8x8xf32>
    %c4_55 = arith.constant 4 : index
    %c0_56 = arith.constant 0 : index
    %c0_57 = arith.constant 0 : index
    %44 = vector.load %arg4[%c4_55, %c0_56, %c0_57] : memref<8x8x8xf32, #tpu.memory_space<vmem>>, vector<1x8x8xf32>
    %45 = vector.shape_cast %44 : vector<1x8x8xf32> to vector<8x8xf32>
    %46 = vector.shape_cast %43 : vector<8x8xf32> to vector<1x8x8xf32>
    tpu.vector_store %arg4[%c4_55, %c0_56, %c0_57], %46 {strides = array<i32>} : memref<8x8x8xf32, #tpu.memory_space<vmem>>, vector<1x8x8xf32>,
    %c5 = arith.constant 5 : index
    %c0_58 = arith.constant 0 : index
    %c0_59 = arith.constant 0 : index
    %47 = vector.load %arg1[%c5, %c0_58, %c0_59] : memref<8x16x16xf32, #tpu.memory_space<vmem>>, vector<1x16x16xf32>
    %48 = vector.shape_cast %47 : vector<1x16x16xf32> to vector<16x16xf32>
    %cst_60 = arith.constant dense<0.000000e+00> : vector<16x8xf32>
    %49 = tpu.matmul %48, %0, %cst_60 {dimension_numbers = #tpu.dot_dimension_numbers<[1], [0], [0], [1], [0, 0, 1, 1], [], []>, precision = #tpu.contract_precision<fp32>} : vector<16x16xf32>, vector<16x8xf32>, vector<16x8xf32> -> vector<16x8xf32>
    %c0_61 = arith.constant 0 : index
    %c0_62 = arith.constant 0 : index
    %50 = vector.load %arg5[%c0_61, %c0_62] : memref<16x8xf32, #tpu.memory_space<vmem>>, vector<16x8xf32>
    tpu.vector_store %arg5[%c0_61, %c0_62], %49 {strides = array<i32>} : memref<16x8xf32, #tpu.memory_space<vmem>>, vector<16x8xf32>,
    %c0_63 = arith.constant 0 : index
    %c0_64 = arith.constant 0 : index
    %51 = vector.load %arg5[%c0_63, %c0_64] : memref<16x8xf32, #tpu.memory_space<vmem>>, vector<16x8xf32>
    %cst_65 = arith.constant dense<0.000000e+00> : vector<8x8xf32>
    %52 = tpu.matmul %1, %51, %cst_65 {dimension_numbers = #tpu.dot_dimension_numbers<[1], [0], [0], [1], [0, 0, 1, 1], [], []>, precision = #tpu.contract_precision<fp32>} : vector<8x16xf32>, vector<16x8xf32>, vector<8x8xf32> -> vector<8x8xf32>
    %c5_66 = arith.constant 5 : index
    %c0_67 = arith.constant 0 : index
    %c0_68 = arith.constant 0 : index
    %53 = vector.load %arg4[%c5_66, %c0_67, %c0_68] : memref<8x8x8xf32, #tpu.memory_space<vmem>>, vector<1x8x8xf32>
    %54 = vector.shape_cast %53 : vector<1x8x8xf32> to vector<8x8xf32>
    %55 = vector.shape_cast %52 : vector<8x8xf32> to vector<1x8x8xf32>
    tpu.vector_store %arg4[%c5_66, %c0_67, %c0_68], %55 {strides = array<i32>} : memref<8x8x8xf32, #tpu.memory_space<vmem>>, vector<1x8x8xf32>,
    %c6 = arith.constant 6 : index
    %c0_69 = arith.constant 0 : index
    %c0_70 = arith.constant 0 : index
    %56 = vector.load %arg1[%c6, %c0_69, %c0_70] : memref<8x16x16xf32, #tpu.memory_space<vmem>>, vector<1x16x16xf32>
    %57 = vector.shape_cast %56 : vector<1x16x16xf32> to vector<16x16xf32>
    %cst_71 = arith.constant dense<0.000000e+00> : vector<16x8xf32>
    %58 = tpu.matmul %57, %0, %cst_71 {dimension_numbers = #tpu.dot_dimension_numbers<[1], [0], [0], [1], [0, 0, 1, 1], [], []>, precision = #tpu.contract_precision<fp32>} : vector<16x16xf32>, vector<16x8xf32>, vector<16x8xf32> -> vector<16x8xf32>
    %c0_72 = arith.constant 0 : index
    %c0_73 = arith.constant 0 : index
    %59 = vector.load %arg5[%c0_72, %c0_73] : memref<16x8xf32, #tpu.memory_space<vmem>>, vector<16x8xf32>
    tpu.vector_store %arg5[%c0_72, %c0_73], %58 {strides = array<i32>} : memref<16x8xf32, #tpu.memory_space<vmem>>, vector<16x8xf32>,
    %c0_74 = arith.constant 0 : index
    %c0_75 = arith.constant 0 : index
    %60 = vector.load %arg5[%c0_74, %c0_75] : memref<16x8xf32, #tpu.memory_space<vmem>>, vector<16x8xf32>
    %cst_76 = arith.constant dense<0.000000e+00> : vector<8x8xf32>
    %61 = tpu.matmul %1, %60, %cst_76 {dimension_numbers = #tpu.dot_dimension_numbers<[1], [0], [0], [1], [0, 0, 1, 1], [], []>, precision = #tpu.contract_precision<fp32>} : vector<8x16xf32>, vector<16x8xf32>, vector<8x8xf32> -> vector<8x8xf32>
    %c6_77 = arith.constant 6 : index
    %c0_78 = arith.constant 0 : index
    %c0_79 = arith.constant 0 : index
    %62 = vector.load %arg4[%c6_77, %c0_78, %c0_79] : memref<8x8x8xf32, #tpu.memory_space<vmem>>, vector<1x8x8xf32>
    %63 = vector.shape_cast %62 : vector<1x8x8xf32> to vector<8x8xf32>
    %64 = vector.shape_cast %61 : vector<8x8xf32> to vector<1x8x8xf32>
    tpu.vector_store %arg4[%c6_77, %c0_78, %c0_79], %64 {strides = array<i32>} : memref<8x8x8xf32, #tpu.memory_space<vmem>>, vector<1x8x8xf32>,
    %c7 = arith.constant 7 : index
    %c0_80 = arith.constant 0 : index
    %c0_81 = arith.constant 0 : index
    %65 = vector.load %arg1[%c7, %c0_80, %c0_81] : memref<8x16x16xf32, #tpu.memory_space<vmem>>, vector<1x16x16xf32>
    %66 = vector.shape_cast %65 : vector<1x16x16xf32> to vector<16x16xf32>
    %cst_82 = arith.constant dense<0.000000e+00> : vector<16x8xf32>
    %67 = tpu.matmul %66, %0, %cst_82 {dimension_numbers = #tpu.dot_dimension_numbers<[1], [0], [0], [1], [0, 0, 1, 1], [], []>, precision = #tpu.contract_precision<fp32>} : vector<16x16xf32>, vector<16x8xf32>, vector<16x8xf32> -> vector<16x8xf32>
    %c0_83 = arith.constant 0 : index
    %c0_84 = arith.constant 0 : index
    %68 = vector.load %arg5[%c0_83, %c0_84] : memref<16x8xf32, #tpu.memory_space<vmem>>, vector<16x8xf32>
    tpu.vector_store %arg5[%c0_83, %c0_84], %67 {strides = array<i32>} : memref<16x8xf32, #tpu.memory_space<vmem>>, vector<16x8xf32>,
    %c0_85 = arith.constant 0 : index
    %c0_86 = arith.constant 0 : index
    %69 = vector.load %arg5[%c0_85, %c0_86] : memref<16x8xf32, #tpu.memory_space<vmem>>, vector<16x8xf32>
    %cst_87 = arith.constant dense<0.000000e+00> : vector<8x8xf32>
    %70 = tpu.matmul %1, %69, %cst_87 {dimension_numbers = #tpu.dot_dimension_numbers<[1], [0], [0], [1], [0, 0, 1, 1], [], []>, precision = #tpu.contract_precision<fp32>} : vector<8x16xf32>, vector<16x8xf32>, vector<8x8xf32> -> vector<8x8xf32>
    %c7_88 = arith.constant 7 : index
    %c0_89 = arith.constant 0 : index
    %c0_90 = arith.constant 0 : index
    %71 = vector.load %arg4[%c7_88, %c0_89, %c0_90] : memref<8x8x8xf32, #tpu.memory_space<vmem>>, vector<1x8x8xf32>
    %72 = vector.shape_cast %71 : vector<1x8x8xf32> to vector<8x8xf32>
    %73 = vector.shape_cast %70 : vector<8x8xf32> to vector<1x8x8xf32>
    tpu.vector_store %arg4[%c7_88, %c0_89, %c0_90], %73 {strides = array<i32>} : memref<8x8x8xf32, #tpu.memory_space<vmem>>, vector<1x8x8xf32>,
    return
  }
  func.func @transform_0(%arg0: i32) -> (i32, i32, i32) {
    %c0_i32 = arith.constant 0 : i32
    %c0_i32_0 = arith.constant 0 : i32
    %c0_i32_1 = arith.constant 0 : i32
    return %arg0, %c0_i32, %c0_i32_0 : i32, i32, i32
  }
  func.func @transform_1(%arg0: i32) -> (i32, i32) {
    %c0_i32 = arith.constant 0 : i32
    %c0_i32_0 = arith.constant 0 : i32
    %c0_i32_1 = arith.constant 0 : i32
    return %c0_i32, %c0_i32_0 : i32, i32
  }
  func.func @transform_2(%arg0: i32) -> (i32, i32) {
    %c0_i32 = arith.constant 0 : i32
    %c0_i32_0 = arith.constant 0 : i32
    %c0_i32_1 = arith.constant 0 : i32
    return %c0_i32, %c0_i32_0 : i32, i32
  }
  func.func @transform_3(%arg0: i32) -> (i32, i32, i32) {
    %c0_i32 = arith.constant 0 : i32
    %c0_i32_0 = arith.constant 0 : i32
    %c0_i32_1 = arith.constant 0 : i32
    return %arg0, %c0_i32, %c0_i32_0 : i32, i32, i32
  }
}

</mosaic_0001>

<bundles_post_ra>
// kernel: tpu_custom_call.1
= control target key start
LH: loop header
LB: loop body
LE: loop exit
PB: predicated region body
PF: predicated region fallthrough
CT: control target
= control target key end

     0   :  { %8 = vsyncpa [#allocation4], 0  ;;  %s9889_s0 = inlined_call_operand.hbm [shape: f32[8,16,16], index: 0, kind: input, shape index: {}]   ;;  %s9890_s1 = inlined_call_operand.vmem [shape: f32[16,8], index: 1, kind: input, shape index: {}]   ;;  %s9891_s2 = inlined_call_operand.vmem [shape: f32[8,16], index: 2, kind: input, shape index: {}]   ;;  %s9892_s3 = inlined_call_operand.hbm [shape: f32[8,8,8], index: 3, kind: output, shape index: {}]  }
   0x1   :  { %9 = vsyncpa [#allocation5], 0  ;;  %s9419_s12 = smov [#allocation3]   ;;  %s9371_s16 = scalar_lea.hbm %s9889_s0, 2048 }
   0x2   :  { %s15_s13 = sshll.u32 %s9419_s12, 4  ;;  %p9372_p0 = scmp.ne.s32.totalorder %s9889_s0, %s9371_s16  ;;  %s16_s13 = int_to_ptr.vmem [resolvable:$true] %s15_s13 }
   0x3   :  { %p9375_p1 = scmp.lt.u32.totalorder %s9371_s16, %s9889_s0 }
   0x5   :  { %p9377_p2 = pnand %p9375_p1, %p9372_p0 }
   0x7   :  { %9380 = shalt.err (!%p9377_p2)
}
   0x8   :  { %s9381_s21 = scalar_lea.vmem %s16_s13, 2048  ;;  %p9386_p4 = scmp.lt.s32.totalorder %s16_s13, %s16_s13 }
   0x9   :  { %p9382_p3 = scmp.ne.s32.totalorder %s16_s13, %s9381_s21  ;;  %p9387_p5 = scmp.lt.s32.totalorder %s9381_s21, %s9381_s21 }
   0xb   :  { %p9388_p6 = por %p9387_p5, %p9386_p4 }
   0xd   :  { %p9389_p7 = pnand %p9388_p6, %p9382_p3 }
   0xf   :  { %9392 = shalt.err (!%p9389_p7)
}
  0x10   :  { %s9420_s22 = smov 128   ;;  %s9421_s23 = smov 8  }
  0x11   :  { %21 = dma.hbm_to_vmem [thread:$0]  %s9889_s0, 2048, %s16_s13, [#allocation4], %s9420_s22, %s9420_s22, %s9421_s23  }
  0x12   :  { %9415 = dma.done.wait [#allocation4], 2048  }
  0x13   :  { %9416 = vsyncadd [#allocation4], 4294965248  ;;  %vm34_vm0 = vcmask 130048   ;;  %v29_v0 = vld [vmem:[%s9890_s1] sm:$0xff]  ;;  %v30_v1 = vld [vmem:[%s9890_s1 + $0x8] sm:$0xff]  ;;  %vm9423_vm1 = vmmov 0  }
  0x14   :  { %v32_v2 = vld [vmem:[#allocation3] sm:$0xff]  ;;  %v42_v3 = vand.u32 4294901760, %v29_v0  ;;  %v45_v4 = vand.u32 4294901760, %v30_v1  ;;  %v33_v6 = vld [vmem:[#allocation3 + $0x8] sm:$0xff]  ;;  %v1012_v30 = vld [vmem:[#allocation3 + $0x10] sm:$0xff]  ;;  %vm543_vm2 = vcmask 64512  }
  0x15   :  { %v36_v5 = vsel %vm34_vm0, %v32_v2, 0  ;;  %v39_v8 = vsel %vm34_vm0, %v33_v6, 0  ;;  %v1015_v31 = vsel %vm34_vm0, %v1012_v30, 0  ;;  %v1013_v32 = vld [vmem:[#allocation3 + $0x18] sm:$0xff]  ;;  %v1988_v44 = vld [vmem:[#allocation3 + $0x20] sm:$0xff]  ;;  %v1989_v46 = vld [vmem:[#allocation3 + $0x28] sm:$0xff] }
  0x16   :  { %v108_v7 = vand.u32 4294901760, %v36_v5  ;;  %v9469_v9 = vpack.c.bf16 %v45_v4, %v42_v3  ;;  %v118_v10 = vand.u32 4294901760, %v39_v8  ;;  %v130_v11 = vsub.f32 %v29_v0, %v42_v3  ;;  %v2964_v58 = vld [vmem:[#allocation3 + $0x30] sm:$0xff]  ;;  %v2965_v60 = vld [vmem:[#allocation3 + $0x38] sm:$0xff] }
  0x17   :  { %v137_v12 = vsub.f32 %v30_v1, %v45_v4  ;;  %v1087_v33 = vand.u32 4294901760, %v1015_v31  ;;  %v1018_v34 = vsel %vm34_vm0, %v1013_v32, 0  ;;  %v1991_v45 = vsel %vm34_vm0, %v1988_v44, 0  ;;  %v4917_v30 = vld [vmem:[#allocation3 + $0x58] sm:$0xff]  ;;  %v5893_v44 = vld [vmem:[#allocation3 + $0x68] sm:$0xff] }
  0x18   :  { %v109_v13 = vsub.f32 %v36_v5, %v108_v7  ;;  %8869 = vmatprep.subr.bf16.mxu0 %v9469_v9  ;;  %v119_v14 = vsub.f32 %v39_v8, %v118_v10  ;;  %v131_v15 = vand.u32 4294901760, %v130_v11  ;;  %v1097_v35 = vand.u32 4294901760, %v1018_v34 }
  0x19   :  { %v138_v16 = vand.u32 4294901760, %v137_v12  ;;  %8871 = vmatpush3.bf16.msra.mxu0 %v9469_v9  ;;  %v9475_v28 = vpack.c.bf16 %v137_v12, %v130_v11  ;;  %v1088_v36 = vsub.f32 %v1015_v31, %v1087_v33  ;;  %v2063_v47 = vand.u32 4294901760, %v1991_v45 }
  0x1a   :  { %v110_v17 = vand.u32 4294901760, %v109_v13  ;;  %v120_v18 = vand.u32 4294901760, %v119_v14  ;;  %v132_v19 = vsub.f32 %v130_v11, %v131_v15  ;;  %v1098_v37 = vsub.f32 %v1018_v34, %v1097_v35  ;;  %v3940_v11 = vld [vmem:[#allocation3 + $0x40] sm:$0xff] }
  0x1b   :  { %v139_v20 = vsub.f32 %v137_v12, %v138_v16  ;;  %v9482_v29 = vpack.c.bf16 %v138_v16, %v131_v15  ;;  %v1089_v38 = vand.u32 4294901760, %v1088_v36  ;;  %v1994_v48 = vsel %vm34_vm0, %v1989_v46, 0 }
  0x1c   :  { %v111_v21 = vsub.f32 %v109_v13, %v110_v17  ;;  %v121_v22 = vsub.f32 %v119_v14, %v120_v18  ;;  %v133_v23 = vand.u32 4294901760, %v132_v19  ;;  %v1099_v39 = vand.u32 4294901760, %v1098_v37 }
  0x1d   :  { %v140_v24 = vand.u32 4294901760, %v139_v20  ;;  %v1090_v40 = vsub.f32 %v1088_v36, %v1089_v38  ;;  %v2073_v49 = vand.u32 4294901760, %v1994_v48  ;;  %v2064_v50 = vsub.f32 %v1991_v45, %v2063_v47 }
  0x1e   :  { %v112_v25 = vand.u32 4294901760, %v111_v21  ;;  %v122_v26 = vand.u32 4294901760, %v121_v22  ;;  %v1100_v41 = vsub.f32 %v1098_v37, %v1099_v39  ;;  %v2967_v59 = vsel %vm34_vm0, %v2964_v58, 0 }
  0x1f   :  { %v9473_v27 = vpack.c.bf16 %v140_v24, %v133_v23  ;;  %v1091_v42 = vand.u32 4294901760, %v1090_v40  ;;  %v2074_v51 = vsub.f32 %v1994_v48, %v2073_v49  ;;  %v2065_v52 = vand.u32 4294901760, %v2064_v50 }
  0x20   :  { %8200 = vmatprep.mubr.f32.mxu0 %v112_v25  ;;  %v1101_v43 = vand.u32 4294901760, %v1100_v41  ;;  %v3039_v61 = vand.u32 4294901760, %v2967_v59  ;;  %v2970_v62 = vsel %vm34_vm0, %v2965_v60, 0  ;;  %v9422_v8 = vmov 0.0|0.0   ;;  %v4916_v25 = vld [vmem:[#allocation3 + $0x50] sm:$0xff] }
  0x21   :  { %8201 = vmatmul.mubr.f32.vlgmr.msra.gmra.mrb[0].mxu0 %v122_v26  ;;  %8873 = vmatprep.subr.bf16.mxu0 %v9473_v27  ;;  %v2075_v53 = vand.u32 4294901760, %v2074_v51  ;;  %v2066_v54 = vsub.f32 %v2064_v50, %v2065_v52  ;;  %v3049_v63 = vand.u32 4294901760, %v2970_v62  ;;  %v3943_v12 = vsel %vm34_vm0, %v3940_v11, 0 }
  0x22   :  { %8875 = vmatpush3.bf16.msra.mxu0 %v9473_v27  ;;  %8207 = vmatprep.mubr.f32.mxu0 %v108_v7  ;;  %v3040_v0 = vsub.f32 %v2967_v59, %v3039_v61  ;;  %v4919_v26 = vsel %vm34_vm0, %v4916_v25, 0  ;;  %v4922_v32 = vsel %vm34_vm0, %v4917_v30, 0  ;;  %v5898_v46 = vsel %vm34_vm0, %v5893_v44, 0 }
  0x23   :  { %8877 = vmatprep.subr.bf16.mxu0 %v9475_v28  ;;  %v2076_v55 = vsub.f32 %v2074_v51, %v2075_v53  ;;  %v2067_v56 = vand.u32 4294901760, %v2066_v54  ;;  %v3050_v1 = vsub.f32 %v2970_v62, %v3049_v63  ;;  %8892 = vmatprep.subr.bf16.mxu1 %v9422_v8  ;;  %v4991_v31 = vand.u32 4294901760, %v4919_v26 }
  0x24   :  { %v3041_v2 = vand.u32 4294901760, %v3040_v0  ;;  %v9570_v48 = vand.u32 4294901760, %v5898_v46 }
  0x25   :  { %v2077_v57 = vand.u32 4294901760, %v2076_v55  ;;  %v3051_v3 = vand.u32 4294901760, %v3050_v1  ;;  %v4992_v34 = vsub.f32 %v4919_v26, %v4991_v31 }
  0x26   :  { %v3042_v4 = vsub.f32 %v3040_v0, %v3041_v2 }
  0x27   :  { %v3052_v5 = vsub.f32 %v3050_v1, %v3051_v3 }
  0x28   :  { %v3043_v6 = vand.u32 4294901760, %v3042_v4 }
  0x29   :  { %8208 = vmatmul.mubr.f32.vlgmr.msra.gmra.mrb[0].mxu0 %v118_v10 }
  0x2a   :  { %8879 = vmatpush3.bf16.msra.mxu0 %v9475_v28  ;;  %8214 = vmatprep.mubr.f32.mxu0 %v109_v13  ;;  %v3941_v13 = vld [vmem:[#allocation3 + $0x48] sm:$0xff] }
  0x2b   :  { %8881 = vmatprep.subr.bf16.mxu0 %v9469_v9  ;;  %v3946_v15 = vsel %vm34_vm0, %v3941_v13, 0 }
  0x2c   :  { %v4025_v16 = vand.u32 4294901760, %v3946_v15 }
  0x31   :  { %8215 = vmatmul.mubr.f32.vlgmr.msra.gmra.mrb[0].mxu0 %v119_v14  ;;  %v4015_v14 = vand.u32 4294901760, %v3943_v12 }
  0x32   :  { %8883 = vmatpush3.bf16.msra.mxu0 %v9469_v9  ;;  %8221 = vmatprep.mubr.f32.mxu0 %v110_v17 }
  0x33   :  { %8885 = vmatprep.subr.bf16.mxu0 %v9482_v29  ;;  %v4016_v17 = vsub.f32 %v3943_v12, %v4015_v14 }
  0x35   :  { %v4017_v19 = vand.u32 4294901760, %v4016_v17 }
  0x37   :  { %v4018_v21 = vsub.f32 %v4016_v17, %v4017_v19 }
  0x39   :  { %8222 = vmatmul.mubr.f32.vlgmr.msra.gmra.mrb[0].mxu0 %v120_v18  ;;  %v4026_v18 = vsub.f32 %v3946_v15, %v4025_v16  ;;  %v4019_v23 = vand.u32 4294901760, %v4018_v21  ;;  %v6869_v21 = vld [vmem:[#allocation3 + $0x78] sm:$0xff] }
  0x3a   :  { %8887 = vmatpush3.bf16.msra.mxu0 %v9482_v29  ;;  %8228 = vmatprep.mubr.f32.mxu0 %v108_v7 }
  0x3b   :  { %8889 = vmatprep.subr.bf16.mxu0 %v9469_v9  ;;  %v4027_v20 = vand.u32 4294901760, %v4026_v18 }
  0x3d   :  { %v4028_v22 = vsub.f32 %v4026_v18, %v4027_v20 }
  0x3f   :  { %v4029_v24 = vand.u32 4294901760, %v4028_v22 }
  0x41   :  { %8229 = vmatmul.mubr.f32.vlgmr.msra.gmra.mrb[0].mxu0 %v118_v10 }
  0x42   :  { %8891 = vmatpush3.bf16.msra.mxu0 %v9469_v9  ;;  %8235 = vmatprep.mubr.f32.mxu0 %v108_v7  ;;  %v3053_v7 = vand.u32 4294901760, %v3052_v5 }
  0x43   :  { %8911 = vmatprep.subr.bf16.mxu0 %v9469_v9 }
  0x49   :  { %8236 = vmatmul.mubr.f32.vlgmr.msra.gmra.mrb[0].mxu0 %v118_v10  ;;  %v9424_v10 = vmov 0.0  }
  0x4a   :  { %8913 = vmatpush3.bf16.msra.mxu0 %v9469_v9  ;;  %8284 = vmatprep.mubr.f32.mxu0 %v1091_v42  ;;  %v5892_v42 = vld [vmem:[#allocation3 + $0x60] sm:$0xff] }
  0x4b   :  { %8915 = vmatprep.subr.bf16.mxu0 %v9473_v27  ;;  %8242 = vmatprep.mubr.msk.f32.mxu1 %vm9423_vm1, %v9424_v10 }
  0x4d   :  { %8285 = vmatmul.mubr.f32.vlgmr.msra.gmra.mrb[2].mxu0 %v1101_v43  ;;  %v5895_v43 = vsel %vm34_vm0, %v5892_v42, 0 }
  0x4e   :  { %8917 = vmatpush3.bf16.msra.mxu0 %v9473_v27  ;;  %8291 = vmatprep.mubr.f32.mxu0 %v1087_v33  ;;  %v9564_v45 = vand.u32 4294901760, %v5895_v43 }
  0x4f   :  { %8919 = vmatprep.subr.bf16.mxu0 %v9475_v28 }
  0x55   :  { %8292 = vmatmul.mubr.f32.vlgmr.msra.gmra.mrb[2].mxu0 %v1097_v35 }
  0x56   :  { %8921 = vmatpush3.bf16.msra.mxu0 %v9475_v28  ;;  %8298 = vmatprep.mubr.f32.mxu0 %v1088_v36  ;;  %v4993_v36 = vand.u32 4294901760, %v4992_v34 }
  0x57   :  { %8923 = vmatprep.subr.bf16.mxu0 %v9469_v9 }
  0x5d   :  { %8299 = vmatmul.mubr.f32.vlgmr.msra.gmra.mrb[2].mxu0 %v1098_v37 }
  0x5e   :  { %8925 = vmatpush3.bf16.msra.mxu0 %v9469_v9  ;;  %8305 = vmatprep.mubr.f32.mxu0 %v1089_v38  ;;  %v4994_v38 = vsub.f32 %v4992_v34, %v4993_v36 }
  0x5f   :  { %8927 = vmatprep.subr.bf16.mxu0 %v9482_v29 }
  0x60   :  { %v4995_v40 = vand.u32 4294901760, %v4994_v38 }
  0x65   :  { %8306 = vmatmul.mubr.f32.vlgmr.msra.gmra.mrb[2].mxu0 %v1099_v39 }
  0x66   :  { %8929 = vmatpush3.bf16.msra.mxu0 %v9482_v29  ;;  %8312 = vmatprep.mubr.f32.mxu0 %v1087_v33 }
  0x67   :  { %8931 = vmatprep.subr.bf16.mxu0 %v9469_v9 }
  0x6d   :  { %8313 = vmatmul.mubr.f32.vlgmr.msra.gmra.mrb[2].mxu0 %v1097_v35 }
  0x6e   :  { %8933 = vmatpush3.bf16.msra.mxu0 %v9469_v9  ;;  %8319 = vmatprep.mubr.f32.mxu0 %v1087_v33  ;;  %v9547_v33 = vand.u32 4294901760, %v4922_v32 }
  0x6f   :  { %8953 = vmatprep.subr.bf16.mxu0 %v9469_v9 }
  0x75   :  { %8320 = vmatmul.mubr.f32.vlgmr.msra.gmra.mrb[2].mxu0 %v1097_v35  ;;  %v5002_v35 = vsub.f32 %v4922_v32, %v9547_v33 }
  0x76   :  { %8955 = vmatpush3.bf16.msra.mxu0 %v9469_v9  ;;  %8368 = vmatprep.mubr.f32.mxu0 %v2067_v56 }
  0x77   :  { %8957 = vmatprep.subr.bf16.mxu0 %v9473_v27  ;;  %v5003_v37 = vand.u32 4294901760, %v5002_v35 }
  0x79   :  { %8369 = vmatmul.mubr.f32.vlgmr.msra.gmra.mrb[4].mxu0 %v2077_v57  ;;  %v5004_v39 = vsub.f32 %v5002_v35, %v5003_v37 }
  0x7a   :  { %8959 = vmatpush3.bf16.msra.mxu0 %v9473_v27  ;;  %8375 = vmatprep.mubr.f32.mxu0 %v2063_v47 }
  0x7b   :  { %8961 = vmatprep.subr.bf16.mxu0 %v9475_v28  ;;  %v5005_v41 = vand.u32 4294901760, %v5004_v39 }
  0x81   :  { %8376 = vmatmul.mubr.f32.vlgmr.msra.gmra.mrb[4].mxu0 %v2073_v49 }
  0x82   :  { %8963 = vmatpush3.bf16.msra.mxu0 %v9475_v28  ;;  %8382 = vmatprep.mubr.f32.mxu0 %v2064_v50 }
  0x83   :  { %8965 = vmatprep.subr.bf16.mxu0 %v9469_v9 }
  0x89   :  { %8383 = vmatmul.mubr.f32.vlgmr.msra.gmra.mrb[4].mxu0 %v2074_v51  ;;  %v9579_v51 = vsub.f32 %v5898_v46, %v9570_v48 }
  0x8a   :  { %8967 = vmatpush3.bf16.msra.mxu0 %v9469_v9  ;;  %8389 = vmatprep.mubr.f32.mxu0 %v2065_v52 }
  0x8b   :  { %8969 = vmatprep.subr.bf16.mxu0 %v9482_v29  ;;  %v5979_v56 = vand.u32 4294901760, %v9579_v51 }
  0x8d   :  { %v5980_v59 = vsub.f32 %v9579_v51, %v5979_v56 }
  0x91   :  { %8390 = vmatmul.mubr.f32.vlgmr.msra.gmra.mrb[4].mxu0 %v2075_v53 }
  0x92   :  { %8971 = vmatpush3.bf16.msra.mxu0 %v9482_v29  ;;  %8396 = vmatprep.mubr.f32.mxu0 %v2063_v47 }
  0x93   :  { %8973 = vmatprep.subr.bf16.mxu0 %v9469_v9 }
  0x99   :  { %8397 = vmatmul.mubr.f32.vlgmr.msra.gmra.mrb[4].mxu0 %v2073_v49 }
  0x9a   :  { %8975 = vmatpush3.bf16.msra.mxu0 %v9469_v9  ;;  %8403 = vmatprep.mubr.f32.mxu0 %v2063_v47  ;;  %v31_v47 = vld [vmem:[%s9891_s2] sm:$0xff]  ;;  %s9425_s2 = smov [#allocation6]  }
  0x9b   :  { %8995 = vmatprep.subr.bf16.mxu0 %v9469_v9  ;;  %v549_v50 = vsel %vm34_vm0, %v31_v47, 0  ;;  %s7848_s30 = sshll.u32 %s9425_s2, 4  ;;  %s7849_s30 = int_to_ptr.vmem [resolvable:$true] %s7848_s30 }
  0x9c   :  { %v9581_v52 = vand.u32 4294901760, %v549_v50  ;;  %s9393_s4 = scalar_lea.vmem %s7849_s30, 1024  ;;  %p9398_p9 = scmp.lt.s32.totalorder %s7849_s30, %s7849_s30 }
  0x9d   :  { %p9394_p8 = scmp.ne.s32.totalorder %s7849_s30, %s9393_s4  ;;  %p9399_p10 = scmp.lt.s32.totalorder %s9393_s4, %s9393_s4 }
  0x9e   :  { %v9588_v57 = vsub.f32 %v549_v50, %v9581_v52 }
  0x9f   :  { %p9400_p11 = por %p9399_p10, %p9398_p9 }
  0xa0   :  { %v9596_v60 = vand.u32 4294901760, %v9588_v57 }
  0xa1   :  { %8404 = vmatmul.mubr.f32.vlgmr.msra.gmra.mrb[4].mxu0 %v2073_v49  ;;  %v9574_v49 = vsub.f32 %v5895_v43, %v9564_v45  ;;  %p9401_p12 = pnand %p9400_p11, %p9394_p8 }
  0xa2   :  { %8997 = vmatpush3.bf16.msra.mxu0 %v9469_v9  ;;  %8452 = vmatprep.mubr.f32.mxu0 %v3043_v6 }
  0xa3   :  { %8999 = vmatprep.subr.bf16.mxu0 %v9473_v27  ;;  %v5969_v53 = vand.u32 4294901760, %v9574_v49 }
  0xa5   :  { %8453 = vmatmul.mubr.f32.vlgmr.msra.gmra.mrb[6].mxu0 %v3053_v7  ;;  %v5970_v58 = vsub.f32 %v9574_v49, %v5969_v53 }
  0xa6   :  { %9001 = vmatpush3.bf16.msra.mxu0 %v9473_v27  ;;  %8459 = vmatprep.mubr.f32.mxu0 %v3039_v61 }
  0xa7   :  { %9003 = vmatprep.subr.bf16.mxu0 %v9475_v28 }
  0xad   :  { %8460 = vmatmul.mubr.f32.vlgmr.msra.gmra.mrb[6].mxu0 %v3049_v63 }
  0xae   :  { %9005 = vmatpush3.bf16.msra.mxu0 %v9475_v28  ;;  %8466 = vmatprep.mubr.f32.mxu0 %v3040_v0 }
  0xaf   :  { %9007 = vmatprep.subr.bf16.mxu0 %v9469_v9 }
  0xb5   :  { %8467 = vmatmul.mubr.f32.vlgmr.msra.gmra.mrb[6].mxu0 %v3050_v1 }
  0xb6   :  { %9009 = vmatpush3.bf16.msra.mxu0 %v9469_v9  ;;  %8473 = vmatprep.mubr.f32.mxu0 %v3041_v2  ;;  %v621_v2 = vsub.f32 %v9588_v57, %v9596_v60 }
  0xb7   :  { %9011 = vmatprep.subr.bf16.mxu0 %v9482_v29 }
  0xb8   :  { %v9605_v7 = vand.u32 4294901760, %v621_v2 }
  0xbd   :  { %8474 = vmatmul.mubr.f32.vlgmr.msra.gmra.mrb[6].mxu0 %v3051_v3 }
  0xbe   :  { %9013 = vmatpush3.bf16.msra.mxu0 %v9482_v29  ;;  %8480 = vmatprep.mubr.f32.mxu0 %v3039_v61 }
  0xbf   :  { %9015 = vmatprep.subr.bf16.mxu0 %v9469_v9 }
  0xc5   :  { %8481 = vmatmul.mubr.f32.vlgmr.msra.gmra.mrb[6].mxu0 %v3049_v63 }
  0xc6   :  { %9017 = vmatpush3.bf16.msra.mxu0 %v9469_v9  ;;  %8487 = vmatprep.mubr.f32.mxu0 %v3039_v61  ;;  %v5971_v61 = vand.u32 4294901760, %v5970_v58 }
  0xc7   :  { %9037 = vmatprep.subr.bf16.mxu0 %v9469_v9 }
  0xcd   :  { %8488 = vmatmul.mubr.f32.vlgmr.msra.gmra.mrb[6].mxu0 %v3049_v63  ;;  %v5981_v63 = vand.u32 4294901760, %v5980_v59 }
  0xce   :  { %9039 = vmatpush3.bf16.msra.mxu0 %v9469_v9  ;;  %8536 = vmatprep.mubr.f32.mxu0 %v4019_v23  ;;  %v6874_v23 = vsel %vm34_vm0, %v6869_v21, 0 }
  0xcf   :  { %9041 = vmatprep.subr.bf16.mxu0 %v9473_v27 }
  0xd1   :  { %8537 = vmatmul.mubr.f32.vlgmr.msra.gmra.mrb[8].mxu0 %v4029_v24  ;;  %v9636_v24 = vand.u32 4294901760, %v6874_v23 }
  0xd2   :  { %9043 = vmatpush3.bf16.msra.mxu0 %v9473_v27  ;;  %8543 = vmatprep.mubr.f32.mxu0 %v4015_v14 }
  0xd3   :  { %9045 = vmatprep.subr.bf16.mxu0 %v9475_v28  ;;  %v9646_v30 = vsub.f32 %v6874_v23, %v9636_v24 }
  0xd9   :  { %8544 = vmatmul.mubr.f32.vlgmr.msra.gmra.mrb[8].mxu0 %v4025_v16 }
  0xda   :  { %9047 = vmatpush3.bf16.msra.mxu0 %v9475_v28  ;;  %8550 = vmatprep.mubr.f32.mxu0 %v4016_v17 }
  0xdb   :  { %9049 = vmatprep.subr.bf16.mxu0 %v9469_v9 }
  0xe1   :  { %8551 = vmatmul.mubr.f32.vlgmr.msra.gmra.mrb[8].mxu0 %v4026_v18 }
  0xe2   :  { %9051 = vmatpush3.bf16.msra.mxu0 %v9469_v9  ;;  %8557 = vmatprep.mubr.f32.mxu0 %v4017_v19  ;;  %v6868_v19 = vld [vmem:[#allocation3 + $0x70] sm:$0xff] }
  0xe3   :  { %9053 = vmatprep.subr.bf16.mxu0 %v9482_v29 }
  0xe9   :  { %8558 = vmatmul.mubr.f32.vlgmr.msra.gmra.mrb[8].mxu0 %v4027_v20  ;;  %v6871_v20 = vsel %vm34_vm0, %v6868_v19, 0 }
  0xea   :  { %9055 = vmatpush3.bf16.msra.mxu0 %v9482_v29  ;;  %8564 = vmatprep.mubr.f32.mxu0 %v4015_v14  ;;  %v9632_v22 = vand.u32 4294901760, %v6871_v20 }
  0xeb   :  { %9057 = vmatprep.subr.bf16.mxu0 %v9469_v9 }
  0xec   :  { %v9641_v25 = vsub.f32 %v6871_v20, %v9632_v22 }
  0xf1   :  { %8565 = vmatmul.mubr.f32.vlgmr.msra.gmra.mrb[8].mxu0 %v4025_v16 }
  0xf2   :  { %9059 = vmatpush3.bf16.msra.mxu0 %v9469_v9  ;;  %8571 = vmatprep.mubr.f32.mxu0 %v4015_v14 }
  0xf3   :  { %9079 = vmatprep.subr.bf16.mxu0 %v9469_v9 }
  0xf9   :  { %8572 = vmatmul.mubr.f32.vlgmr.msra.gmra.mrb[8].mxu0 %v4025_v16 }
  0xfa   :  { %9081 = vmatpush3.bf16.msra.mxu0 %v9469_v9  ;;  %8620 = vmatprep.mubr.f32.mxu0 %v4995_v40 }
  0xfb   :  { %9083 = vmatprep.subr.bf16.mxu0 %v9473_v27 }
  0xfd   :  { %8621 = vmatmul.mubr.f32.vlgmr.msra.gmra.mrb[10].mxu0 %v5005_v41 }
  0xfe   :  { %9085 = vmatpush3.bf16.msra.mxu0 %v9473_v27  ;;  %8627 = vmatprep.mubr.f32.mxu0 %v4991_v31 }
  0xff   :  { %9087 = vmatprep.subr.bf16.mxu0 %v9475_v28 }
 0x105   :  { %8628 = vmatmul.mubr.f32.vlgmr.msra.gmra.mrb[10].mxu0 %v9547_v33 }
 0x106   :  { %9089 = vmatpush3.bf16.msra.mxu0 %v9475_v28  ;;  %8634 = vmatprep.mubr.f32.mxu0 %v4992_v34  ;;  %v6955_v34 = vand.u32 4294901760, %v9646_v30 }
 0x107   :  { %9091 = vmatprep.subr.bf16.mxu0 %v9469_v9 }
 0x10d   :  { %8635 = vmatmul.mubr.f32.vlgmr.msra.gmra.mrb[10].mxu0 %v5002_v35 }
 0x10e   :  { %9093 = vmatpush3.bf16.msra.mxu0 %v9469_v9  ;;  %8641 = vmatprep.mubr.f32.mxu0 %v4993_v36  ;;  %v6956_v36 = vsub.f32 %v9646_v30, %v6955_v34 }
 0x10f   :  { %9095 = vmatprep.subr.bf16.mxu0 %v9482_v29 }
 0x110   :  { %v6957_v39 = vand.u32 4294901760, %v6956_v36 }
 0x115   :  { %8642 = vmatmul.mubr.f32.vlgmr.msra.gmra.mrb[10].mxu0 %v5003_v37 }
 0x116   :  { %9097 = vmatpush3.bf16.msra.mxu0 %v9482_v29  ;;  %8648 = vmatprep.mubr.f32.mxu0 %v4991_v31 }
 0x117   :  { %9099 = vmatprep.subr.bf16.mxu0 %v9469_v9 }
 0x11c   :  { %v8237_v54 = vpop.f32.mrb[0].mxu0 }
 0x11d   :  { %545 = vst.msk [vmem:[#allocation2 + $0x8] sm:$0xff] %vm543_vm2, %v8237_v54  ;;  %v533_v55 = vpop.f32.mrb[1].mxu0  ;;  %8649 = vmatmul.mubr.f32.vlgmr.msra.gmra.mrb[10].mxu0 %v9547_v33 }
 0x11e   :  { %544 = vst.msk [vmem:[#allocation2] sm:$0xff] %vm543_vm2, %v533_v55  ;;  %9101 = vmatpush3.bf16.msra.mxu0 %v9469_v9  ;;  %8655 = vmatprep.mubr.f32.mxu0 %v4991_v31  ;;  %v6945_v31 = vand.u32 4294901760, %v9641_v25 }
 0x11f   :  { %9121 = vmatprep.subr.bf16.mxu0 %v9469_v9 }
 0x120   :  { %v6946_v35 = vsub.f32 %v9641_v25, %v6945_v31 }
 0x122   :  { %v6947_v37 = vand.u32 4294901760, %v6946_v35 }
 0x124   :  { %v547_v62 = vld [vmem:[#allocation2 + $0x8] sm:$0xff] }
 0x125   :  { %8656 = vmatmul.mubr.f32.vlgmr.msra.gmra.mrb[10].mxu0 %v9547_v33  ;;  %v546_v0 = vld [vmem:[#allocation2] sm:$0xff]  ;;  %v555_v1 = vand.u32 4294901760, %v547_v62 }
 0x126   :  { %9123 = vmatpush3.bf16.msra.mxu0 %v9469_v9  ;;  %8704 = vmatprep.mubr.f32.mxu0 %v5971_v61  ;;  %v552_v3 = vand.u32 4294901760, %v546_v0 }
 0x127   :  { %v637_v4 = vsub.f32 %v547_v62, %v555_v1  ;;  %9125 = vmatprep.subr.bf16.mxu0 %v9473_v27 }
 0x128   :  { %v9603_v5 = vpack.c.bf16 %v555_v1, %v552_v3  ;;  %v630_v6 = vsub.f32 %v546_v0, %v552_v3 }
 0x129   :  { %8705 = vmatmul.mubr.f32.vlgmr.msra.gmra.mrb[12].mxu0 %v5981_v63  ;;  %v638_v11 = vand.u32 4294901760, %v637_v4 }
 0x12a   :  { %8894 = vmatpush3.bf16.msra.mxu1 %v9603_v5  ;;  %9127 = vmatpush3.bf16.msra.mxu0 %v9473_v27  ;;  %v631_v12 = vand.u32 4294901760, %v630_v6  ;;  %v8899_v18 = vpack.c.bf16 %v637_v4, %v630_v6 }
 0x12b   :  { %8711 = vmatprep.mubr.f32.mxu0 %v9564_v45  ;;  %8895 = vmatprep.subr.bf16.mxu1 %v9422_v8  ;;  %v639_v13 = vsub.f32 %v637_v4, %v638_v11 }
 0x12c   :  { %v632_v14 = vsub.f32 %v630_v6, %v631_v12  ;;  %9129 = vmatprep.subr.bf16.mxu0 %v9475_v28  ;;  %v8905_v26 = vpack.c.bf16 %v638_v11, %v631_v12 }
 0x12d   :  { %8243 = vmatmul.mubr.f32.vlgmr.msra.gmra.mrb[0].mxu1 %v9605_v7  ;;  %v640_v15 = vand.u32 4294901760, %v639_v13 }
 0x12e   :  { %v633_v16 = vand.u32 4294901760, %v632_v14  ;;  %8249 = vmatprep.mubr.msk.f32.mxu1 %vm9423_vm1, %v9424_v10 }
 0x130   :  { %v8896_v17 = vpack.c.bf16 %v640_v15, %v633_v16 }
 0x131   :  { %8712 = vmatmul.mubr.f32.vlgmr.msra.gmra.mrb[12].mxu0 %v9570_v48 }
 0x132   :  { %8897 = vmatpush3.bf16.msra.mxu1 %v8896_v17  ;;  %9131 = vmatpush3.bf16.msra.mxu0 %v9475_v28 }
 0x133   :  { %8898 = vmatprep.subr.bf16.mxu1 %v9422_v8  ;;  %8718 = vmatprep.mubr.f32.mxu0 %v9574_v49 }
 0x134   :  { %9133 = vmatprep.subr.bf16.mxu0 %v9469_v9 }
 0x135   :  { %8250 = vmatmul.mubr.f32.vlgmr.msra.gmra.mrb[0].mxu1 %v9581_v52 }
 0x136   :  { %8900 = vmatpush3.bf16.msra.mxu1 %v8899_v18  ;;  %8256 = vmatprep.mubr.msk.f32.mxu1 %vm9423_vm1, %v9424_v10 }
 0x137   :  { %8901 = vmatprep.subr.bf16.mxu1 %v9422_v8 }
 0x139   :  { %8719 = vmatmul.mubr.f32.vlgmr.msra.gmra.mrb[12].mxu0 %v9579_v51 }
 0x13a   :  { %9135 = vmatpush3.bf16.msra.mxu0 %v9469_v9  ;;  %8725 = vmatprep.mubr.f32.mxu0 %v5969_v53 }
 0x13b   :  { %9137 = vmatprep.subr.bf16.mxu0 %v9482_v29 }
 0x13d   :  { %8257 = vmatmul.mubr.f32.vlgmr.msra.gmra.mrb[0].mxu1 %v9588_v57 }
 0x13e   :  { %8903 = vmatpush3.bf16.msra.mxu1 %v9603_v5  ;;  %8263 = vmatprep.mubr.msk.f32.mxu1 %vm9423_vm1, %v9424_v10 }
 0x13f   :  { %8904 = vmatprep.subr.bf16.mxu1 %v9422_v8 }
 0x141   :  { %8726 = vmatmul.mubr.f32.vlgmr.msra.gmra.mrb[12].mxu0 %v5979_v56 }
 0x142   :  { %9139 = vmatpush3.bf16.msra.mxu0 %v9482_v29  ;;  %8732 = vmatprep.mubr.f32.mxu0 %v9564_v45 }
 0x143   :  { %9141 = vmatprep.subr.bf16.mxu0 %v9469_v9 }
 0x145   :  { %8264 = vmatmul.mubr.f32.vlgmr.msra.gmra.mrb[0].mxu1 %v9596_v60 }
 0x146   :  { %8906 = vmatpush3.bf16.msra.mxu1 %v8905_v26  ;;  %8270 = vmatprep.mubr.msk.f32.mxu1 %vm9423_vm1, %v9424_v10 }
 0x147   :  { %8907 = vmatprep.subr.bf16.mxu1 %v9422_v8 }
 0x148   :  { %v8321_v32 = vpop.f32.mrb[2].mxu0 }
 0x149   :  { %1523 = vst.msk [vmem:[#allocation2 + $0x8] sm:$0xff] %vm543_vm2, %v8321_v32  ;;  %v1512_v33 = vpop.f32.mrb[3].mxu0  ;;  %8733 = vmatmul.mubr.f32.vlgmr.msra.gmra.mrb[12].mxu0 %v9570_v48 }
 0x14a   :  { %1522 = vst.msk [vmem:[#allocation2] sm:$0xff] %vm543_vm2, %v1512_v33  ;;  %9143 = vmatpush3.bf16.msra.mxu0 %v9469_v9  ;;  %8739 = vmatprep.mubr.f32.mxu0 %v9564_v45 }
 0x14b   :  { %9163 = vmatprep.subr.bf16.mxu0 %v9469_v9 }
 0x14d   :  { %8271 = vmatmul.mubr.f32.vlgmr.msra.gmra.mrb[0].mxu1 %v9581_v52 }
 0x14e   :  { %8909 = vmatpush3.bf16.msra.mxu1 %v9603_v5  ;;  %8277 = vmatprep.mubr.msk.f32.mxu1 %vm9423_vm1, %v9424_v10 }
 0x14f   :  { %8934 = vmatprep.subr.bf16.mxu1 %v9422_v8 }
 0x150   :  { %v1525_v38 = vld [vmem:[#allocation2 + $0x8] sm:$0xff] }
 0x151   :  { %8740 = vmatmul.mubr.f32.vlgmr.msra.gmra.mrb[12].mxu0 %v9570_v48  ;;  %v1524_v40 = vld [vmem:[#allocation2] sm:$0xff]  ;;  %v1530_v41 = vand.u32 4294901760, %v1525_v38 }
 0x152   :  { %9165 = vmatpush3.bf16.msra.mxu0 %v9469_v9  ;;  %8788 = vmatprep.mubr.f32.mxu0 %v6947_v37  ;;  %v1527_v42 = vand.u32 4294901760, %v1524_v40 }
 0x153   :  { %v1612_v43 = vsub.f32 %v1525_v38, %v1530_v41  ;;  %9167 = vmatprep.subr.bf16.mxu0 %v9473_v27 }
 0x154   :  { %v8935_v44 = vpack.c.bf16 %v1530_v41, %v1527_v42  ;;  %v1605_v45 = vsub.f32 %v1524_v40, %v1527_v42 }
 0x155   :  { %8278 = vmatmul.mubr.f32.vlgmr.msra.gmra.mrb[0].mxu1 %v9581_v52  ;;  %8789 = vmatmul.mubr.f32.vlgmr.msra.gmra.mrb[14].mxu0 %v6957_v39  ;;  %v1613_v46 = vand.u32 4294901760, %v1612_v43 }
 0x156   :  { %8936 = vmatpush3.bf16.msra.mxu1 %v8935_v44  ;;  %8326 = vmatprep.mubr.msk.f32.mxu1 %vm9423_vm1, %v9424_v10  ;;  %v1606_v47 = vand.u32 4294901760, %v1605_v45 }
 0x157   :  { %9169 = vmatpush3.bf16.msra.mxu0 %v9473_v27  ;;  %8795 = vmatprep.mubr.f32.mxu0 %v9632_v22  ;;  %v1614_v48 = vsub.f32 %v1612_v43, %v1613_v46  ;;  %v8941_v27 = vpack.c.bf16 %v1612_v43, %v1605_v45 }
 0x158   :  { %8937 = vmatprep.subr.bf16.mxu1 %v9422_v8  ;;  %v1607_v49 = vsub.f32 %v1605_v45, %v1606_v47  ;;  %9171 = vmatprep.subr.bf16.mxu0 %v9475_v28 }
 0x159   :  { %8327 = vmatmul.mubr.f32.vlgmr.msra.gmra.mrb[2].mxu1 %v9605_v7  ;;  %v1615_v50 = vand.u32 4294901760, %v1614_v48 }
 0x15a   :  { %v1608_v51 = vand.u32 4294901760, %v1607_v49  ;;  %8333 = vmatprep.mubr.msk.f32.mxu1 %vm9423_vm1, %v9424_v10 }
 0x15c   :  { %v8938_v53 = vpack.c.bf16 %v1615_v50, %v1608_v51 }
 0x15d   :  { %8796 = vmatmul.mubr.f32.vlgmr.msra.gmra.mrb[14].mxu0 %v9636_v24 }
 0x15e   :  { %8939 = vmatpush3.bf16.msra.mxu1 %v8938_v53  ;;  %9173 = vmatpush3.bf16.msra.mxu0 %v9475_v28  ;;  %v8947_v28 = vpack.c.bf16 %v1613_v46, %v1606_v47 }
 0x15f   :  { %8940 = vmatprep.subr.bf16.mxu1 %v9422_v8  ;;  %8802 = vmatprep.mubr.f32.mxu0 %v9641_v25 }
 0x160   :  { %9175 = vmatprep.subr.bf16.mxu0 %v9469_v9 }
 0x161   :  { %8334 = vmatmul.mubr.f32.vlgmr.msra.gmra.mrb[2].mxu1 %v9581_v52 }
 0x162   :  { %8942 = vmatpush3.bf16.msra.mxu1 %v8941_v27  ;;  %8340 = vmatprep.mubr.msk.f32.mxu1 %vm9423_vm1, %v9424_v10 }
 0x163   :  { %8943 = vmatprep.subr.bf16.mxu1 %v9422_v8 }
 0x165   :  { %8803 = vmatmul.mubr.f32.vlgmr.msra.gmra.mrb[14].mxu0 %v9646_v30 }
 0x166   :  { %9177 = vmatpush3.bf16.msra.mxu0 %v9469_v9  ;;  %8809 = vmatprep.mubr.f32.mxu0 %v6945_v31 }
 0x167   :  { %9179 = vmatprep.subr.bf16.mxu0 %v9482_v29 }
 0x169   :  { %8341 = vmatmul.mubr.f32.vlgmr.msra.gmra.mrb[2].mxu1 %v9588_v57 }
 0x16a   :  { %8945 = vmatpush3.bf16.msra.mxu1 %v8935_v44  ;;  %8347 = vmatprep.mubr.msk.f32.mxu1 %vm9423_vm1, %v9424_v10 }
 0x16b   :  { %8946 = vmatprep.subr.bf16.mxu1 %v9422_v8 }
 0x16d   :  { %8810 = vmatmul.mubr.f32.vlgmr.msra.gmra.mrb[14].mxu0 %v6955_v34 }
 0x16e   :  { %9181 = vmatpush3.bf16.msra.mxu0 %v9482_v29  ;;  %8816 = vmatprep.mubr.f32.mxu0 %v9632_v22 }
 0x16f   :  { %9183 = vmatprep.subr.bf16.mxu0 %v9469_v9 }
 0x171   :  { %8348 = vmatmul.mubr.f32.vlgmr.msra.gmra.mrb[2].mxu1 %v9596_v60 }
 0x172   :  { %8948 = vmatpush3.bf16.msra.mxu1 %v8947_v28  ;;  %8354 = vmatprep.mubr.msk.f32.mxu1 %vm9423_vm1, %v9424_v10 }
 0x173   :  { %8949 = vmatprep.subr.bf16.mxu1 %v9422_v8 }
 0x174   :  { %v8405_v54 = vpop.f32.mrb[4].mxu0 }
 0x175   :  { %2499 = vst.msk [vmem:[#allocation2 + $0x8] sm:$0xff] %vm543_vm2, %v8405_v54  ;;  %v2488_v55 = vpop.f32.mrb[5].mxu0  ;;  %8817 = vmatmul.mubr.f32.vlgmr.msra.gmra.mrb[14].mxu0 %v9636_v24 }
 0x176   :  { %2498 = vst.msk [vmem:[#allocation2] sm:$0xff] %vm543_vm2, %v2488_v55  ;;  %9185 = vmatpush3.bf16.msra.mxu0 %v9469_v9  ;;  %8823 = vmatprep.mubr.f32.mxu0 %v9632_v22 }
 0x179   :  { %8355 = vmatmul.mubr.f32.vlgmr.msra.gmra.mrb[2].mxu1 %v9581_v52 }
 0x17a   :  { %8951 = vmatpush3.bf16.msra.mxu1 %v8935_v44  ;;  %8361 = vmatprep.mubr.msk.f32.mxu1 %vm9423_vm1, %v9424_v10 }
 0x17b   :  { %8976 = vmatprep.subr.bf16.mxu1 %v9422_v8 }
 0x17c   :  { %v2501_v29 = vld [vmem:[#allocation2 + $0x8] sm:$0xff] }
 0x17d   :  { %8824 = vmatmul.mubr.f32.vlgmr.msra.gmra.mrb[14].mxu0 %v9636_v24  ;;  %v2500_v56 = vld [vmem:[#allocation2] sm:$0xff]  ;;  %v2506_v58 = vand.u32 4294901760, %v2501_v29 }
 0x17e   :  { %v2503_v59 = vand.u32 4294901760, %v2500_v56 }
 0x17f   :  { %v2588_v61 = vsub.f32 %v2501_v29, %v2506_v58 }
 0x180   :  { %v8977_v62 = vpack.c.bf16 %v2506_v58, %v2503_v59  ;;  %v2581_v63 = vsub.f32 %v2500_v56, %v2503_v59 }
 0x181   :  { %8362 = vmatmul.mubr.f32.vlgmr.msra.gmra.mrb[2].mxu1 %v9581_v52  ;;  %v2589_v9 = vand.u32 4294901760, %v2588_v61 }
 0x182   :  { %8978 = vmatpush3.bf16.msra.mxu1 %v8977_v62  ;;  %8410 = vmatprep.mubr.msk.f32.mxu1 %vm9423_vm1, %v9424_v10  ;;  %v2582_v0 = vand.u32 4294901760, %v2581_v63  ;;  %v8983_v6 = vpack.c.bf16 %v2588_v61, %v2581_v63 }
 0x183   :  { %8979 = vmatprep.subr.bf16.mxu1 %v9422_v8  ;;  %v2590_v1 = vsub.f32 %v2588_v61, %v2589_v9 }
 0x184   :  { %v2583_v2 = vsub.f32 %v2581_v63, %v2582_v0  ;;  %v8989_v11 = vpack.c.bf16 %v2589_v9, %v2582_v0 }
 0x185   :  { %8411 = vmatmul.mubr.f32.vlgmr.msra.gmra.mrb[4].mxu1 %v9605_v7  ;;  %v2591_v3 = vand.u32 4294901760, %v2590_v1 }
 0x186   :  { %v2584_v4 = vand.u32 4294901760, %v2583_v2  ;;  %8417 = vmatprep.mubr.msk.f32.mxu1 %vm9423_vm1, %v9424_v10 }
 0x188   :  { %v8980_v5 = vpack.c.bf16 %v2591_v3, %v2584_v4 }
 0x18a   :  { %8981 = vmatpush3.bf16.msra.mxu1 %v8980_v5 }
 0x18b   :  { %8982 = vmatprep.subr.bf16.mxu1 %v9422_v8 }
 0x18d   :  { %8418 = vmatmul.mubr.f32.vlgmr.msra.gmra.mrb[4].mxu1 %v9581_v52 }
 0x18e   :  { %8984 = vmatpush3.bf16.msra.mxu1 %v8983_v6  ;;  %8424 = vmatprep.mubr.msk.f32.mxu1 %vm9423_vm1, %v9424_v10 }
 0x18f   :  { %8985 = vmatprep.subr.bf16.mxu1 %v9422_v8 }
 0x195   :  { %8425 = vmatmul.mubr.f32.vlgmr.msra.gmra.mrb[4].mxu1 %v9588_v57 }
 0x196   :  { %8987 = vmatpush3.bf16.msra.mxu1 %v8977_v62  ;;  %8431 = vmatprep.mubr.msk.f32.mxu1 %vm9423_vm1, %v9424_v10 }
 0x197   :  { %8988 = vmatprep.subr.bf16.mxu1 %v9422_v8 }
 0x19d   :  { %8432 = vmatmul.mubr.f32.vlgmr.msra.gmra.mrb[4].mxu1 %v9596_v60 }
 0x19e   :  { %8990 = vmatpush3.bf16.msra.mxu1 %v8989_v11  ;;  %8438 = vmatprep.mubr.msk.f32.mxu1 %vm9423_vm1, %v9424_v10 }
 0x19f   :  { %8991 = vmatprep.subr.bf16.mxu1 %v9422_v8 }
 0x1a0   :  { %v8489_v12 = vpop.f32.mrb[6].mxu0 }
 0x1a1   :  { %3475 = vst.msk [vmem:[#allocation2 + $0x8] sm:$0xff] %vm543_vm2, %v8489_v12  ;;  %v3464_v13 = vpop.f32.mrb[7].mxu0 }
 0x1a2   :  { %3474 = vst.msk [vmem:[#allocation2] sm:$0xff] %vm543_vm2, %v3464_v13 }
 0x1a5   :  { %8439 = vmatmul.mubr.f32.vlgmr.msra.gmra.mrb[4].mxu1 %v9581_v52 }
 0x1a6   :  { %8993 = vmatpush3.bf16.msra.mxu1 %v8977_v62  ;;  %8445 = vmatprep.mubr.msk.f32.mxu1 %vm9423_vm1, %v9424_v10 }
 0x1a7   :  { %9018 = vmatprep.subr.bf16.mxu1 %v9422_v8 }
 0x1a8   :  { %v3477_v14 = vld [vmem:[#allocation2 + $0x8] sm:$0xff] }
 0x1a9   :  { %v3476_v15 = vld [vmem:[#allocation2] sm:$0xff]  ;;  %v3482_v16 = vand.u32 4294901760, %v3477_v14 }
 0x1aa   :  { %v3479_v17 = vand.u32 4294901760, %v3476_v15 }
 0x1ab   :  { %v3564_v18 = vsub.f32 %v3477_v14, %v3482_v16 }
 0x1ac   :  { %v9019_v19 = vpack.c.bf16 %v3482_v16, %v3479_v17  ;;  %v3557_v20 = vsub.f32 %v3476_v15, %v3479_v17 }
 0x1ad   :  { %8446 = vmatmul.mubr.f32.vlgmr.msra.gmra.mrb[4].mxu1 %v9581_v52  ;;  %v3565_v21 = vand.u32 4294901760, %v3564_v18 }
 0x1ae   :  { %9020 = vmatpush3.bf16.msra.mxu1 %v9019_v19  ;;  %8494 = vmatprep.mubr.msk.f32.mxu1 %vm9423_vm1, %v9424_v10  ;;  %v3558_v22 = vand.u32 4294901760, %v3557_v20  ;;  %v9025_v31 = vpack.c.bf16 %v3564_v18, %v3557_v20 }
 0x1af   :  { %9021 = vmatprep.subr.bf16.mxu1 %v9422_v8  ;;  %v3566_v23 = vsub.f32 %v3564_v18, %v3565_v21 }
 0x1b0   :  { %v3559_v24 = vsub.f32 %v3557_v20, %v3558_v22  ;;  %v9031_v32 = vpack.c.bf16 %v3565_v21, %v3558_v22 }
 0x1b1   :  { %8495 = vmatmul.mubr.f32.vlgmr.msra.gmra.mrb[6].mxu1 %v9605_v7  ;;  %v3567_v25 = vand.u32 4294901760, %v3566_v23 }
 0x1b2   :  { %v3560_v26 = vand.u32 4294901760, %v3559_v24  ;;  %8501 = vmatprep.mubr.msk.f32.mxu1 %vm9423_vm1, %v9424_v10 }
 0x1b4   :  { %v9022_v30 = vpack.c.bf16 %v3567_v25, %v3560_v26 }
 0x1b6   :  { %9023 = vmatpush3.bf16.msra.mxu1 %v9022_v30 }
 0x1b7   :  { %9024 = vmatprep.subr.bf16.mxu1 %v9422_v8 }
 0x1b9   :  { %8502 = vmatmul.mubr.f32.vlgmr.msra.gmra.mrb[6].mxu1 %v9581_v52 }
 0x1ba   :  { %9026 = vmatpush3.bf16.msra.mxu1 %v9025_v31  ;;  %8508 = vmatprep.mubr.msk.f32.mxu1 %vm9423_vm1, %v9424_v10 }
 0x1bb   :  { %9027 = vmatprep.subr.bf16.mxu1 %v9422_v8 }
 0x1c1   :  { %8509 = vmatmul.mubr.f32.vlgmr.msra.gmra.mrb[6].mxu1 %v9588_v57 }
 0x1c2   :  { %9029 = vmatpush3.bf16.msra.mxu1 %v9019_v19  ;;  %8515 = vmatprep.mubr.msk.f32.mxu1 %vm9423_vm1, %v9424_v10 }
 0x1c3   :  { %9030 = vmatprep.subr.bf16.mxu1 %v9422_v8 }
 0x1c9   :  { %8516 = vmatmul.mubr.f32.vlgmr.msra.gmra.mrb[6].mxu1 %v9596_v60 }
 0x1ca   :  { %9032 = vmatpush3.bf16.msra.mxu1 %v9031_v32  ;;  %8522 = vmatprep.mubr.msk.f32.mxu1 %vm9423_vm1, %v9424_v10 }
 0x1cb   :  { %9033 = vmatprep.subr.bf16.mxu1 %v9422_v8 }
 0x1cc   :  { %v8573_v33 = vpop.f32.mrb[8].mxu0 }
 0x1cd   :  { %4451 = vst.msk [vmem:[#allocation2 + $0x8] sm:$0xff] %vm543_vm2, %v8573_v33  ;;  %v4440_v34 = vpop.f32.mrb[9].mxu0 }
 0x1ce   :  { %4450 = vst.msk [vmem:[#allocation2] sm:$0xff] %vm543_vm2, %v4440_v34 }
 0x1d1   :  { %8523 = vmatmul.mubr.f32.vlgmr.msra.gmra.mrb[6].mxu1 %v9581_v52 }
 0x1d2   :  { %9035 = vmatpush3.bf16.msra.mxu1 %v9019_v19  ;;  %8529 = vmatprep.mubr.msk.f32.mxu1 %vm9423_vm1, %v9424_v10 }
 0x1d3   :  { %9060 = vmatprep.subr.bf16.mxu1 %v9422_v8 }
 0x1d4   :  { %v4453_v35 = vld [vmem:[#allocation2 + $0x8] sm:$0xff] }
 0x1d5   :  { %v4452_v36 = vld [vmem:[#allocation2] sm:$0xff]  ;;  %v4458_v37 = vand.u32 4294901760, %v4453_v35 }
 0x1d6   :  { %v4455_v38 = vand.u32 4294901760, %v4452_v36 }
 0x1d7   :  { %v4540_v39 = vsub.f32 %v4453_v35, %v4458_v37 }
 0x1d8   :  { %v9061_v40 = vpack.c.bf16 %v4458_v37, %v4455_v38  ;;  %v4533_v41 = vsub.f32 %v4452_v36, %v4455_v38 }
 0x1d9   :  { %8530 = vmatmul.mubr.f32.vlgmr.msra.gmra.mrb[6].mxu1 %v9581_v52  ;;  %v4541_v42 = vand.u32 4294901760, %v4540_v39 }
 0x1da   :  { %9062 = vmatpush3.bf16.msra.mxu1 %v9061_v40  ;;  %8578 = vmatprep.mubr.msk.f32.mxu1 %vm9423_vm1, %v9424_v10  ;;  %v4534_v43 = vand.u32 4294901760, %v4533_v41  ;;  %v9067_v49 = vpack.c.bf16 %v4540_v39, %v4533_v41 }
 0x1db   :  { %9063 = vmatprep.subr.bf16.mxu1 %v9422_v8  ;;  %v4542_v44 = vsub.f32 %v4540_v39, %v4541_v42 }
 0x1dc   :  { %v4535_v45 = vsub.f32 %v4533_v41, %v4534_v43  ;;  %v9073_v50 = vpack.c.bf16 %v4541_v42, %v4534_v43 }
 0x1dd   :  { %8579 = vmatmul.mubr.f32.vlgmr.msra.gmra.mrb[8].mxu1 %v9605_v7  ;;  %v4543_v46 = vand.u32 4294901760, %v4542_v44 }
 0x1de   :  { %v4536_v47 = vand.u32 4294901760, %v4535_v45  ;;  %8585 = vmatprep.mubr.msk.f32.mxu1 %vm9423_vm1, %v9424_v10 }
 0x1e0   :  { %v9064_v48 = vpack.c.bf16 %v4543_v46, %v4536_v47 }
 0x1e2   :  { %9065 = vmatpush3.bf16.msra.mxu1 %v9064_v48 }
 0x1e3   :  { %9066 = vmatprep.subr.bf16.mxu1 %v9422_v8 }
 0x1e5   :  { %8586 = vmatmul.mubr.f32.vlgmr.msra.gmra.mrb[8].mxu1 %v9581_v52 }
 0x1e6   :  { %9068 = vmatpush3.bf16.msra.mxu1 %v9067_v49  ;;  %8592 = vmatprep.mubr.msk.f32.mxu1 %vm9423_vm1, %v9424_v10 }
 0x1e7   :  { %9069 = vmatprep.subr.bf16.mxu1 %v9422_v8 }
 0x1ed   :  { %8593 = vmatmul.mubr.f32.vlgmr.msra.gmra.mrb[8].mxu1 %v9588_v57 }
 0x1ee   :  { %9071 = vmatpush3.bf16.msra.mxu1 %v9061_v40  ;;  %8599 = vmatprep.mubr.msk.f32.mxu1 %vm9423_vm1, %v9424_v10 }
 0x1ef   :  { %9072 = vmatprep.subr.bf16.mxu1 %v9422_v8 }
 0x1f5   :  { %8600 = vmatmul.mubr.f32.vlgmr.msra.gmra.mrb[8].mxu1 %v9596_v60 }
 0x1f6   :  { %9074 = vmatpush3.bf16.msra.mxu1 %v9073_v50  ;;  %8606 = vmatprep.mubr.msk.f32.mxu1 %vm9423_vm1, %v9424_v10 }
 0x1f7   :  { %9075 = vmatprep.subr.bf16.mxu1 %v9422_v8 }
 0x1f8   :  { %v8657_v51 = vpop.f32.mrb[10].mxu0 }
 0x1f9   :  { %5427 = vst.msk [vmem:[#allocation2 + $0x8] sm:$0xff] %vm543_vm2, %v8657_v51  ;;  %v5416_v53 = vpop.f32.mrb[11].mxu0 }
 0x1fa   :  { %5426 = vst.msk [vmem:[#allocation2] sm:$0xff] %vm543_vm2, %v5416_v53 }
 0x1fd   :  { %8607 = vmatmul.mubr.f32.vlgmr.msra.gmra.mrb[8].mxu1 %v9581_v52 }
 0x1fe   :  { %9077 = vmatpush3.bf16.msra.mxu1 %v9061_v40  ;;  %8613 = vmatprep.mubr.msk.f32.mxu1 %vm9423_vm1, %v9424_v10 }
 0x1ff   :  { %9102 = vmatprep.subr.bf16.mxu1 %v9422_v8 }
 0x200   :  { %v5429_v27 = vld [vmem:[#allocation2 + $0x8] sm:$0xff] }
 0x201   :  { %v5428_v28 = vld [vmem:[#allocation2] sm:$0xff]  ;;  %v5434_v54 = vand.u32 4294901760, %v5429_v27 }
 0x202   :  { %v5431_v55 = vand.u32 4294901760, %v5428_v28 }
 0x203   :  { %v5516_v29 = vsub.f32 %v5429_v27, %v5434_v54 }
 0x204   :  { %v9103_v56 = vpack.c.bf16 %v5434_v54, %v5431_v55  ;;  %v5509_v58 = vsub.f32 %v5428_v28, %v5431_v55 }
 0x205   :  { %8614 = vmatmul.mubr.f32.vlgmr.msra.gmra.mrb[8].mxu1 %v9581_v52  ;;  %v5517_v59 = vand.u32 4294901760, %v5516_v29 }
 0x206   :  { %9104 = vmatpush3.bf16.msra.mxu1 %v9103_v56  ;;  %8662 = vmatprep.mubr.msk.f32.mxu1 %vm9423_vm1, %v9424_v10  ;;  %v5510_v61 = vand.u32 4294901760, %v5509_v58  ;;  %v9109_v2 = vpack.c.bf16 %v5516_v29, %v5509_v58 }
 0x207   :  { %9105 = vmatprep.subr.bf16.mxu1 %v9422_v8  ;;  %v5518_v62 = vsub.f32 %v5516_v29, %v5517_v59 }
 0x208   :  { %v5511_v63 = vsub.f32 %v5509_v58, %v5510_v61  ;;  %v9115_v3 = vpack.c.bf16 %v5517_v59, %v5510_v61 }
 0x209   :  { %8663 = vmatmul.mubr.f32.vlgmr.msra.gmra.mrb[10].mxu1 %v9605_v7  ;;  %v5519_v9 = vand.u32 4294901760, %v5518_v62 }
 0x20a   :  { %v5512_v0 = vand.u32 4294901760, %v5511_v63  ;;  %8669 = vmatprep.mubr.msk.f32.mxu1 %vm9423_vm1, %v9424_v10 }
 0x20c   :  { %v9106_v1 = vpack.c.bf16 %v5519_v9, %v5512_v0 }
 0x20e   :  { %9107 = vmatpush3.bf16.msra.mxu1 %v9106_v1 }
 0x20f   :  { %9108 = vmatprep.subr.bf16.mxu1 %v9422_v8 }
 0x211   :  { %8670 = vmatmul.mubr.f32.vlgmr.msra.gmra.mrb[10].mxu1 %v9581_v52 }
 0x212   :  { %9110 = vmatpush3.bf16.msra.mxu1 %v9109_v2  ;;  %8676 = vmatprep.mubr.msk.f32.mxu1 %vm9423_vm1, %v9424_v10 }
 0x213   :  { %9111 = vmatprep.subr.bf16.mxu1 %v9422_v8 }
 0x219   :  { %8677 = vmatmul.mubr.f32.vlgmr.msra.gmra.mrb[10].mxu1 %v9588_v57 }
 0x21a   :  { %9113 = vmatpush3.bf16.msra.mxu1 %v9103_v56  ;;  %8683 = vmatprep.mubr.msk.f32.mxu1 %vm9423_vm1, %v9424_v10 }
 0x21b   :  { %9114 = vmatprep.subr.bf16.mxu1 %v9422_v8 }
 0x221   :  { %8684 = vmatmul.mubr.f32.vlgmr.msra.gmra.mrb[10].mxu1 %v9596_v60 }
 0x222   :  { %9116 = vmatpush3.bf16.msra.mxu1 %v9115_v3  ;;  %8690 = vmatprep.mubr.msk.f32.mxu1 %vm9423_vm1, %v9424_v10 }
 0x223   :  { %9117 = vmatprep.subr.bf16.mxu1 %v9422_v8 }
 0x224   :  { %v8741_v4 = vpop.f32.mrb[12].mxu0 }
 0x225   :  { %6403 = vst.msk [vmem:[#allocation2 + $0x8] sm:$0xff] %vm543_vm2, %v8741_v4  ;;  %v6392_v5 = vpop.f32.mrb[13].mxu0 }
 0x226   :  { %6402 = vst.msk [vmem:[#allocation2] sm:$0xff] %vm543_vm2, %v6392_v5 }
 0x228   :  { %v1006_v6 = vpop.f32.mrb[0].mxu1 }
 0x229   :  { %1010 = vst.msk [vmem:[#allocation6] sm:$0xff] %vm543_vm2, %v1006_v6  ;;  %v8279_v11 = vpop.f32.mrb[1].mxu1  ;;  %8691 = vmatmul.mubr.f32.vlgmr.msra.gmra.mrb[10].mxu1 %v9581_v52 }
 0x22a   :  { %9119 = vmatpush3.bf16.msra.mxu1 %v9103_v56  ;;  %8697 = vmatprep.mubr.msk.f32.mxu1 %vm9423_vm1, %v9424_v10 }
 0x22b   :  { %9144 = vmatprep.subr.bf16.mxu1 %v9422_v8 }
 0x22c   :  { %v6405_v12 = vld [vmem:[#allocation2 + $0x8] sm:$0xff] }
 0x22d   :  { %v6404_v13 = vld [vmem:[#allocation2] sm:$0xff]  ;;  %v6410_v14 = vand.u32 4294901760, %v6405_v12 }
 0x22e   :  { %v6407_v15 = vand.u32 4294901760, %v6404_v13 }
 0x22f   :  { %v6492_v16 = vsub.f32 %v6405_v12, %v6410_v14 }
 0x230   :  { %v9145_v17 = vpack.c.bf16 %v6410_v14, %v6407_v15  ;;  %v6485_v18 = vsub.f32 %v6404_v13, %v6407_v15 }
 0x231   :  { %8698 = vmatmul.mubr.f32.vlgmr.msra.gmra.mrb[10].mxu1 %v9581_v52  ;;  %v6493_v19 = vand.u32 4294901760, %v6492_v16 }
 0x232   :  { %9146 = vmatpush3.bf16.msra.mxu1 %v9145_v17  ;;  %8746 = vmatprep.mubr.msk.f32.mxu1 %vm9423_vm1, %v9424_v10  ;;  %v6486_v20 = vand.u32 4294901760, %v6485_v18  ;;  %v9151_v26 = vpack.c.bf16 %v6492_v16, %v6485_v18 }
 0x233   :  { %9147 = vmatprep.subr.bf16.mxu1 %v9422_v8  ;;  %v6494_v21 = vsub.f32 %v6492_v16, %v6493_v19 }
 0x234   :  { %v6487_v22 = vsub.f32 %v6485_v18, %v6486_v20  ;;  %v9157_v30 = vpack.c.bf16 %v6493_v19, %v6486_v20 }
 0x235   :  { %8747 = vmatmul.mubr.f32.vlgmr.msra.gmra.mrb[12].mxu1 %v9605_v7  ;;  %v6495_v23 = vand.u32 4294901760, %v6494_v21 }
 0x236   :  { %v6488_v24 = vand.u32 4294901760, %v6487_v22  ;;  %8753 = vmatprep.mubr.msk.f32.mxu1 %vm9423_vm1, %v9424_v10 }
 0x238   :  { %v9148_v25 = vpack.c.bf16 %v6495_v23, %v6488_v24 }
 0x23a   :  { %9149 = vmatpush3.bf16.msra.mxu1 %v9148_v25 }
 0x23b   :  { %9150 = vmatprep.subr.bf16.mxu1 %v9422_v8 }
 0x23d   :  { %8754 = vmatmul.mubr.f32.vlgmr.msra.gmra.mrb[12].mxu1 %v9581_v52 }
 0x23e   :  { %9152 = vmatpush3.bf16.msra.mxu1 %v9151_v26  ;;  %8760 = vmatprep.mubr.msk.f32.mxu1 %vm9423_vm1, %v9424_v10 }
 0x23f   :  { %9153 = vmatprep.subr.bf16.mxu1 %v9422_v8 }
 0x245   :  { %8761 = vmatmul.mubr.f32.vlgmr.msra.gmra.mrb[12].mxu1 %v9588_v57 }
 0x246   :  { %9155 = vmatpush3.bf16.msra.mxu1 %v9145_v17  ;;  %8767 = vmatprep.mubr.msk.f32.mxu1 %vm9423_vm1, %v9424_v10 }
 0x247   :  { %9156 = vmatprep.subr.bf16.mxu1 %v9422_v8 }
 0x24d   :  { %8768 = vmatmul.mubr.f32.vlgmr.msra.gmra.mrb[12].mxu1 %v9596_v60 }
 0x24e   :  { %9158 = vmatpush3.bf16.msra.mxu1 %v9157_v30  ;;  %8774 = vmatprep.mubr.msk.f32.mxu1 %vm9423_vm1, %v9424_v10 }
 0x24f   :  { %9159 = vmatprep.subr.bf16.mxu1 %v9422_v8 }
 0x250   :  { %v8825_v31 = vpop.f32.mrb[14].mxu0 }
 0x251   :  { %7379 = vst.msk [vmem:[#allocation2 + $0x8] sm:$0xff] %vm543_vm2, %v8825_v31  ;;  %v7368_v32 = vpop.f32.mrb[15].mxu0 }
 0x252   :  { %7378 = vst.msk [vmem:[#allocation2] sm:$0xff] %vm543_vm2, %v7368_v32 }
 0x254   :  { %v1981_v33 = vpop.f32.mrb[2].mxu1 }
 0x255   :  { %1986 = vst.msk [vmem:[#allocation6 + $0x8] sm:$0xff] %vm543_vm2, %v1981_v33  ;;  %v8363_v34 = vpop.f32.mrb[3].mxu1  ;;  %8775 = vmatmul.mubr.f32.vlgmr.msra.gmra.mrb[12].mxu1 %v9581_v52 }
 0x256   :  { %9161 = vmatpush3.bf16.msra.mxu1 %v9145_v17  ;;  %8781 = vmatprep.mubr.msk.f32.mxu1 %vm9423_vm1, %v9424_v10 }
 0x257   :  { %9186 = vmatprep.subr.bf16.mxu1 %v9422_v8 }
 0x258   :  { %v7381_v35 = vld [vmem:[#allocation2 + $0x8] sm:$0xff] }
 0x259   :  { %v7380_v36 = vld [vmem:[#allocation2] sm:$0xff]  ;;  %v7386_v37 = vand.u32 4294901760, %v7381_v35 }
 0x25a   :  { %v7383_v38 = vand.u32 4294901760, %v7380_v36 }
 0x25b   :  { %v7468_v39 = vsub.f32 %v7381_v35, %v7386_v37 }
 0x25c   :  { %v9187_v40 = vpack.c.bf16 %v7386_v37, %v7383_v38  ;;  %v7461_v41 = vsub.f32 %v7380_v36, %v7383_v38 }
 0x25d   :  { %8782 = vmatmul.mubr.f32.vlgmr.msra.gmra.mrb[12].mxu1 %v9581_v52  ;;  %v7469_v42 = vand.u32 4294901760, %v7468_v39 }
 0x25e   :  { %9188 = vmatpush3.bf16.msra.mxu1 %v9187_v40  ;;  %8830 = vmatprep.mubr.msk.f32.mxu1 %vm9423_vm1, %v9424_v10  ;;  %v7462_v43 = vand.u32 4294901760, %v7461_v41  ;;  %v9193_v49 = vpack.c.bf16 %v7468_v39, %v7461_v41 }
 0x25f   :  { %9189 = vmatprep.subr.bf16.mxu1 %v9422_v8  ;;  %v7470_v44 = vsub.f32 %v7468_v39, %v7469_v42 }
 0x260   :  { %v7463_v45 = vsub.f32 %v7461_v41, %v7462_v43 }
 0x261   :  { %8831 = vmatmul.mubr.f32.vlgmr.msra.gmra.mrb[14].mxu1 %v9605_v7  ;;  %v7471_v46 = vand.u32 4294901760, %v7470_v44  ;;  %v9199_v7 = vpack.c.bf16 %v7469_v42, %v7462_v43 }
 0x262   :  { %v7464_v47 = vand.u32 4294901760, %v7463_v45  ;;  %8837 = vmatprep.mubr.msk.f32.mxu1 %vm9423_vm1, %v9424_v10 }
 0x264   :  { %v9190_v48 = vpack.c.bf16 %v7471_v46, %v7464_v47 }
 0x266   :  { %9191 = vmatpush3.bf16.msra.mxu1 %v9190_v48 }
 0x267   :  { %9192 = vmatprep.subr.bf16.mxu1 %v9422_v8 }
 0x269   :  { %8838 = vmatmul.mubr.f32.vlgmr.msra.gmra.mrb[14].mxu1 %v9581_v52 }
 0x26a   :  { %9194 = vmatpush3.bf16.msra.mxu1 %v9193_v49  ;;  %8844 = vmatprep.mubr.msk.f32.mxu1 %vm9423_vm1, %v9424_v10 }
 0x26b   :  { %9195 = vmatprep.subr.bf16.mxu1 %v9422_v8 }
 0x271   :  { %8845 = vmatmul.mubr.f32.vlgmr.msra.gmra.mrb[14].mxu1 %v9588_v57 }
 0x272   :  { %9197 = vmatpush3.bf16.msra.mxu1 %v9187_v40  ;;  %8851 = vmatprep.mubr.msk.f32.mxu1 %vm9423_vm1, %v9424_v10 }
 0x273   :  { %9198 = vmatprep.subr.bf16.mxu1 %v9422_v8 }
 0x279   :  { %8852 = vmatmul.mubr.f32.vlgmr.msra.gmra.mrb[14].mxu1 %v9596_v60 }
 0x27a   :  { %9200 = vmatpush3.bf16.msra.mxu1 %v9199_v7  ;;  %8858 = vmatprep.mubr.msk.f32.mxu1 %vm9423_vm1, %v9424_v10 }
 0x27b   :  { %9201 = vmatprep.subr.bf16.mxu1 %v9422_v8 }
 0x280   :  { %v2957_v50 = vpop.f32.mrb[4].mxu1 }
 0x281   :  { %2962 = vst.msk [vmem:[#allocation6 + $0x10] sm:$0xff] %vm543_vm2, %v2957_v50  ;;  %v8447_v51 = vpop.f32.mrb[5].mxu1  ;;  %8859 = vmatmul.mubr.f32.vlgmr.msra.gmra.mrb[14].mxu1 %v9581_v52 }
 0x282   :  { %9203 = vmatpush3.bf16.msra.mxu1 %v9187_v40  ;;  %8865 = vmatprep.mubr.msk.f32.mxu1 %vm9423_vm1, %v9424_v10 }
 0x289   :  { %8866 = vmatmul.mubr.f32.vlgmr.msra.gmra.mrb[14].mxu1 %v9581_v52 }
 0x2ac   :  { %v3933_v57 = vpop.f32.mrb[6].mxu1 }
 0x2ad   :  { %3938 = vst.msk [vmem:[#allocation6 + $0x18] sm:$0xff] %vm543_vm2, %v3933_v57  ;;  %v8531_v60 = vpop.f32.mrb[7].mxu1 }
 0x2d8   :  { %v4909_v53 = vpop.f32.mrb[8].mxu1 }
 0x2d9   :  { %4914 = vst.msk [vmem:[#allocation6 + $0x20] sm:$0xff] %vm543_vm2, %v4909_v53  ;;  %v8615_v8 = vpop.f32.mrb[9].mxu1 }
 0x304   :  { %v5885_v27 = vpop.f32.mrb[10].mxu1 }
 0x305   :  { %5890 = vst.msk [vmem:[#allocation6 + $0x28] sm:$0xff] %vm543_vm2, %v5885_v27  ;;  %v8699_v28 = vpop.f32.mrb[11].mxu1 }
 0x330   :  { %v6861_v54 = vpop.f32.mrb[12].mxu1 }
 0x331   :  { %6866 = vst.msk [vmem:[#allocation6 + $0x30] sm:$0xff] %vm543_vm2, %v6861_v54  ;;  %v8783_v55 = vpop.f32.mrb[13].mxu1 }
 0x35c   :  { %v7837_v10 = vpop.f32.mrb[14].mxu1 }
 0x35d   :  { %7842 = vst.msk [vmem:[#allocation6 + $0x38] sm:$0xff] %vm543_vm2, %v7837_v10  ;;  %v8867_v52 = vpop.f32.mrb[15].mxu1 }
 0x35e   :  { %9404 = shalt.err (!%p9401_p12)
}
 0x35f   :  { %s9405_s7 = scalar_lea.hbm %s9892_s3, 1024 }
 0x360   :  { %p9406_p13 = scmp.ne.s32.totalorder %s9892_s3, %s9405_s7  ;;  %p9409_p0 = scmp.lt.u32.totalorder %s9405_s7, %s9892_s3 }
 0x362   :  { %p9411_p1 = pnand %p9409_p0, %p9406_p13 }
 0x364   :  { %9414 = shalt.err (!%p9411_p1)
}
 0x365   :  { %7854 = dma.vmem_to_hbm [thread:$0]  %s7849_s30, 1024, %s9892_s3, [#allocation5], %s9420_s22, %s9420_s22, %s9421_s23  }
 0x366   :  { %9417 = dma.done.wait [#allocation5], 1024  }
 0x367   :  { %9418 = vsyncadd [#allocation5], 4294966272 }
 0x368   :  { %7858 = vsyncpa [#allocation4], 1 }
 0x369   :  { %7859 = vsyncpa [#allocation5], 1 }

</bundles_post_ra>
